<compile_context>
chip_gen: v5e
topology: v5e:2x2
jax: 0.10.0
libtpu: 0.0.40
codegen_flags: <defaults>
</compile_context>

<pallas_src>
import functools

import jax
import jax.numpy as jnp
from jax.experimental import pallas as pl
from jax.experimental.pallas import tpu as pltpu


# ---------------------------------------------------------------------------
# in-kernel helpers (avoid jax.nn internals inside Mosaic)
# ---------------------------------------------------------------------------
def _sigmoid(x):
    return 1.0 / (1.0 + jnp.exp(-x))


def _softmax_last(x):
    x = x - jnp.max(x, axis=-1, keepdims=True)
    e = jnp.exp(x)
    return e / jnp.sum(e, axis=-1, keepdims=True)


def _softmax_axis0(x):
    x = x - jnp.max(x, axis=0, keepdims=True)
    e = jnp.exp(x)
    return e / jnp.sum(e, axis=0, keepdims=True)


# ---------------------------------------------------------------------------
# Kernel 1: gated query<->passage attention  (produces GRU1 inputs)
#   s_j[c]   = sum_r v[r] * tanh(w_u_q[r,c]*u_q[j,c] + w_u_p[r,c]*u_p_t[c])
#   a        = softmax_c(s)            (per (t, j))
#   c_q_t[c] = sum_j a[j,c] * u_q[j,c]
#   g_t      = sigmoid(w_g @ [u_p_t; c_q_t]) * [u_p_t; c_q_t]
# ---------------------------------------------------------------------------
def gated_attention_kernel(uq_ref, up_ref, wuq_ref, wup_ref, v_ref, wgT_ref,
                           out_ref, cq_ref):
    # uq: (m,h)  up: (n,h)  wuq/wup: (h,h)  v: (h,1)  wgT: (2h,2h)=w_g.T
    # out: (n,2h)  cq_ref: (n,h) VMEM scratch holding the c_q rows
    uq = uq_ref[...]
    A = wuq_ref[...]
    Bm = wup_ref[...]
    vcol = v_ref[...]
    n = up_ref.shape[0]

    # hoisted query-side term (m, h, h); reused for every timestep t
    auq = A[None, :, :] * uq[:, None, :]
    # TODO(synk): at production h~300 chunk the r (sublane) axis of the tanh term and
    # accumulate into an (m,h) scratch so live VMEM stays bounded (v7x 64 MiB / v5e 16 MiB).

    def body(t, carry):
        up_t = up_ref[pl.ds(t, 1), :]                               # (1, h)
        tt = jnp.tanh(auq + (Bm * up_t)[None, :, :])                # (m, h, h)
        st = jnp.sum(tt * vcol[None, :, :], axis=1)                 # (m, h)
        at = _softmax_last(st)                                      # (m, h)
        cq_ref[pl.ds(t, 1), :] = jnp.sum(at * uq, axis=0, keepdims=True)
        return carry

    jax.lax.fori_loop(0, n, body, 0)

    # batched gate: ONE (n,2h)@(2h,2h) matmul + sigmoid + single full-block store
    x = jnp.concatenate([up_ref[...], cq_ref[...]], axis=-1)        # (n, 2h)
    gate = _sigmoid(jnp.dot(x, wgT_ref[...], preferred_element_type=jnp.float32))
    out_ref[...] = gate * x


def gated_attention(u_q, u_ps, w_u_q, w_u_p, v, w_g):
    k, n, h = u_ps.shape
    m = u_q.shape[0]
    return pl.pallas_call(
        gated_attention_kernel,
        out_shape=jax.ShapeDtypeStruct((k, n, 2 * h), jnp.float32),
        grid=(k,),
        in_specs=[
            pl.BlockSpec((m, h), lambda i: (0, 0)),
            pl.BlockSpec((None, n, h), lambda i: (i, 0, 0)),
            pl.BlockSpec((h, h), lambda i: (0, 0)),
            pl.BlockSpec((h, h), lambda i: (0, 0)),
            pl.BlockSpec((h, 1), lambda i: (0, 0)),
            pl.BlockSpec((2 * h, 2 * h), lambda i: (0, 0)),
        ],
        out_specs=pl.BlockSpec((None, n, 2 * h), lambda i: (i, 0, 0)),
        scratch_shapes=[pltpu.VMEM((n, h), jnp.float32)],
        compiler_params=pltpu.CompilerParams(dimension_semantics=("parallel",)),
    )(u_q, u_ps, w_u_q, w_u_p, v, w_g.T)


# ---------------------------------------------------------------------------
# Kernel 2a: generic linear  y = x @ W^T + b   (used for the hoisted GRU input projection)
# ---------------------------------------------------------------------------
def linear_kernel(x_ref, wT_ref, b_ref, o_ref):
    o_ref[...] = (jnp.dot(x_ref[...], wT_ref[...],
                          preferred_element_type=jnp.float32) + b_ref[...])


def _linear(x, wT, b):
    R = x.shape[0]
    Dout = wT.shape[1]
    return pl.pallas_call(
        linear_kernel,
        out_shape=jax.ShapeDtypeStruct((R, Dout), jnp.float32),
    )(x, wT, b)


# ---------------------------------------------------------------------------
# Kernel 2b: GRU recurrence (PyTorch gate order r, z, n), all B sequences batched.
# Input projections (and the r/z biases) are precomputed for the whole sequence.
# ---------------------------------------------------------------------------
def gru_rec_kernel(xr_ref, xz_ref, xn_ref, h0_ref, whr_ref, whz_ref, whn_ref,
                   bhn_ref, out_ref):
    # xr/xz/xn: (T,B,H)  h0: (B,H)  wh*: (H,H) per-gate (transposed)  bhn: (1,H)
    # out: (T,B,H)
    T = xr_ref.shape[0]
    whr = whr_ref[...]
    whz = whz_ref[...]
    whn = whn_ref[...]
    bhn = bhn_ref[...]

    def step(t, h):
        hg_r = jnp.dot(h, whr, preferred_element_type=jnp.float32)
        hg_z = jnp.dot(h, whz, preferred_element_type=jnp.float32)
        hg_n = jnp.dot(h, whn, preferred_element_type=jnp.float32) + bhn
        r = _sigmoid(xr_ref[t] + hg_r)
        z = _sigmoid(xz_ref[t] + hg_z)
        nn = jnp.tanh(xn_ref[t] + r * hg_n)
        h_new = (1.0 - z) * nn + z * h
        out_ref[t] = h_new
        return h_new

    jax.lax.fori_loop(0, T, step, h0_ref[...])


def run_gru(x, h0, w_ih, w_hh, b_ih, b_hh):
    # x: (B,T,Din), h0: (B,H) -> full hidden sequence (B,T,H)
    B, T, Din = x.shape
    H = h0.shape[1]
    # hoist the full input projection: one (T*B, Din)@(Din, 3H) matmul
    x_tm = jnp.transpose(x, (1, 0, 2)).reshape(T * B, Din)
    xg = _linear(x_tm, w_ih.T, b_ih.reshape(1, 3 * H)).reshape(T, B, 3 * H)
    # per-gate splits done in the wrapper so in-kernel slices are whole blocks
    xr = xg[..., 0:H] + b_hh[0:H]
    xz = xg[..., H:2 * H] + b_hh[H:2 * H]
    xn = xg[..., 2 * H:3 * H]
    out_tm = pl.pallas_call(
        gru_rec_kernel,
        out_shape=jax.ShapeDtypeStruct((T, B, H), jnp.float32),
    )(xr, xz, xn, h0,
      w_hh[0:H, :].T, w_hh[H:2 * H, :].T, w_hh[2 * H:3 * H, :].T,
      b_hh[2 * H:3 * H].reshape(1, H))
    return jnp.transpose(out_tm, (1, 0, 2))


# ---------------------------------------------------------------------------
# Kernel 3: fused tail (pre-GRU2): shared pointer projection + start-pointer logits
#           + passage-ranking logits, all from one load of v_flat.
# ---------------------------------------------------------------------------
def tail_pre_kernel(n, k, vflat_ref, rq_ref, whp_ref, wha_ref, vcol_ref, vrow_ref,
                    wvpT_ref, wvqT_ref, wg1T_ref, wg2T_ref, vg_ref,
                    pt_ref, s1_ref, g_ref):
    vflat = vflat_ref[...]                                          # (N, h)
    rq = rq_ref[...]                                                # (1, h)
    vcol = vcol_ref[...]                                            # (h, 1)
    vrow = vrow_ref[...]                                            # (1, h)
    dn = (((1,), (1,)), ((), ()))                                   # A @ B^T contraction

    # shared start/end pointer projection (transposed -> lane-dense pointer logits)
    pt = jax.lax.dot_general(whp_ref[...], vflat, dn,
                             preferred_element_type=jnp.float32)    # (h, N)
    pt_ref[...] = pt

    # start-pointer logits, lane-dense (1, N)
    qa = jax.lax.dot_general(wha_ref[...], rq, dn,
                             preferred_element_type=jnp.float32)    # (h, 1)
    s1_ref[...] = jnp.dot(vrow, jnp.tanh(pt + qa),
                          preferred_element_type=jnp.float32)       # (1, N)

    # passage ranking: one batched (N,h)@(h,h) matmul over all k*n positions
    qv = jnp.dot(rq, wvqT_ref[...], preferred_element_type=jnp.float32)            # (1, h)
    tv = jnp.tanh(jnp.dot(vflat, wvpT_ref[...],
                          preferred_element_type=jnp.float32) + qv)                # (N, h)
    sv = jnp.dot(tv, vcol, preferred_element_type=jnp.float32)                     # (N, 1)
    wg_rq = jnp.dot(rq, wg1T_ref[...], preferred_element_type=jnp.float32)         # (1, 2h)
    rps = []
    for i in range(k):                                   # k is tiny & static
        a_p = _softmax_axis0(sv[i * n:(i + 1) * n])                                # (n, 1)
        rps.append(jnp.sum(a_p * vflat[i * n:(i + 1) * n], axis=0, keepdims=True))  # (1, h)
    rp = jnp.concatenate(rps, axis=0)                                              # (k, h)
    z = jnp.tanh(wg_rq + jnp.dot(rp, wg2T_ref[...],
                                 preferred_element_type=jnp.float32))              # (k, 2h)
    g_ref[...] = jnp.dot(z, vg_ref[...], preferred_element_type=jnp.float32)       # (k, 1)


def tail_pre(v_flat, r_q, p, n, k):
    N, h = v_flat.shape
    kern = functools.partial(tail_pre_kernel, n, k)
    return pl.pallas_call(
        kern,
        out_shape=(jax.ShapeDtypeStruct((h, N), jnp.float32),
                   jax.ShapeDtypeStruct((1, N), jnp.float32),
                   jax.ShapeDtypeStruct((k, 1), jnp.float32)),
    )(v_flat, r_q, p["w_h_p"], p["w_h_a"], p["v"], p["v"].T,
      p["w_v_p"].T, p["w_v_q"].T, p["w_g"][:, :h].T, p["w_g"][:, h:].T, p["v_g"])


# ---------------------------------------------------------------------------
# Kernel 4: end-pointer logits, reusing the cached w_h_p projection (lane-dense output)
# ---------------------------------------------------------------------------
def tail_end_kernel(pt_ref, hta_ref, wha_ref, vrow_ref, s2_ref):
    dn = (((1,), (1,)), ((), ()))
    qa = jax.lax.dot_general(wha_ref[...], hta_ref[...], dn,
                             preferred_element_type=jnp.float32)    # (h, 1)
    s2_ref[...] = jnp.dot(vrow_ref[...], jnp.tanh(pt_ref[...] + qa),
                          preferred_element_type=jnp.float32)       # (1, N)


def tail_end(pt, h_t_a, w_h_a, v):
    h, N = pt.shape
    return pl.pallas_call(
        tail_end_kernel,
        out_shape=jax.ShapeDtypeStruct((1, N), jnp.float32),
    )(pt, h_t_a, w_h_a, v.T)


# ---------------------------------------------------------------------------
# Full forward pass (glue in plain JAX, hot paths in the kernels above)
# ---------------------------------------------------------------------------
def evidence_extractor_forward(u_q, u_ps, p):
    m, h = u_q.shape
    k, n, _ = u_ps.shape
    N = k * n

    # gated attention over (query, passage) -> GRU1 inputs
    gs = gated_attention(u_q, u_ps, p["w_u_q"], p["w_u_p"], p["v"], p["w_g"])  # (k,n,2h)

    # GRU1 (zero initial state), all k passages batched in one kernel
    v_ps = run_gru(gs, jnp.zeros((k, h), jnp.float32),
                   p["gru1_w_ih"], p["gru1_w_hh"], p["gru1_b_ih"], p["gru1_b_hh"])  # (k,n,h)

    # question representation: in the reference the softmax is over a size-1 axis and
    # is identically 1.0, so r_q is exactly the column-sum of u_q
    # (w_u_q / w_v_q / v_r_q cancel out of this path).
    r_q = jnp.sum(u_q, axis=0, keepdims=True)                                   # (1, h)

    # fused tail: shared pointer projection, start-pointer logits, passage-rank logits
    v_flat = v_ps.reshape(N, h)
    pt, s1_row, g = tail_pre(v_flat, r_q, p, n, k)          # (h,N), (1,N), (k,1)

    # start pointer: softmax over a size-1 axis -> all ones (mirrors the reference)
    a_1 = jax.nn.softmax(s1_row.reshape(N, 1), axis=-1)
    p_1 = jnp.argmax(a_1.reshape(-1))

    # evidence summary via GRU2 (initial hidden = r_q, take final hidden state)
    scale = a_1.reshape(-1)[:k]                              # zip(v_ps, a_1) semantics
    c = (scale[:, None, None] * v_ps).reshape(1, N, h)
    h_seq = run_gru(c, r_q, p["gru2_w_ih"], p["gru2_w_hh"],
                    p["gru2_b_ih"], p["gru2_b_hh"])                              # (1,N,h)
    h_t_a = h_seq[0, -1, :].reshape(1, h)

    # end pointer (real softmax over positions), reusing the cached projection
    s2_row = tail_end(pt, h_t_a, p["w_h_a"], p["v"])                             # (1, N)
    a_2 = jax.nn.softmax(s2_row.reshape(-1), axis=0).reshape(N, 1)
    p_2 = jnp.argmax(a_2)

    # passage ranking
    psg_ranks = jax.nn.softmax(g.reshape(-1), axis=0)                            # (k,)

    return (p_1, a_1), (p_2, a_2), psg_ranks


# ---------------------------------------------------------------------------
# deterministic parameter init (shapes mirror the nn.Module; synthetic values)
# ---------------------------------------------------------------------------
def init_params(key, h):
    keys = jax.random.split(key, 18)
    u = lambda kk, shp: jax.random.uniform(kk, shp, jnp.float32)          # like torch.rand
    s = 1.0 / jnp.sqrt(jnp.float32(h))
    g = lambda kk, shp: jax.random.uniform(kk, shp, jnp.float32, -s, s)   # GRU-style init
    return dict(
        v=u(keys[0], (h, 1)),
        v_g=u(keys[1], (2 * h, 1)),
        w_u_q=u(keys[2], (h, h)),
        w_u_p=u(keys[3], (h, h)),
        w_v_q=u(keys[4], (h, h)),
        w_v_p=u(keys[5], (h, h)),
        w_h_p=u(keys[6], (h, h)),
        w_h_a=u(keys[7], (h, h)),
        v_r_q=u(keys[8], (h, 1)),    # unused numerically (degenerate softmax path)
        w_g=u(keys[9], (2 * h, 2 * h)),
        gru1_w_ih=g(keys[10], (3 * h, 2 * h)),
        gru1_w_hh=g(keys[11], (3 * h, h)),
        gru1_b_ih=g(keys[12], (3 * h,)),
        gru1_b_hh=g(keys[13], (3 * h,)),
        gru2_w_ih=g(keys[14], (3 * h, h)),
        gru2_w_hh=g(keys[15], (3 * h, h)),
        gru2_b_ih=g(keys[16], (3 * h,)),
        gru2_b_hh=g(keys[17], (3 * h,)),
    )


if __name__ == "__main__":
    H = 32    # embedding/hidden dim (module uses 300; small for the demo)
    M = 8     # query length
    NP = 8    # passage length
    K = 3     # number of passages

    key = jax.random.PRNGKey(0)
    k_uq, k_up, k_param = jax.random.split(key, 3)
    u_q = jax.random.normal(k_uq, (M, H), jnp.float32)
    u_ps = jax.random.normal(k_up, (K, NP, H), jnp.float32)
    params = init_params(k_param, H)

    fwd = jax.jit(evidence_extractor_forward)
    (p_1, a_1), (p_2, a_2), psg_ranks = fwd(u_q, u_ps, params)
    jax.block_until_ready((p_1, a_1, p_2, a_2, psg_ranks))

    assert a_1.shape == (K * NP, 1)
    assert a_2.shape == (K * NP, 1)
    assert psg_ranks.shape == (K,)
    assert bool(jnp.isfinite(a_2).all()) and bool(jnp.isfinite(psg_ranks).all())
    print("KERNEL_OK")
</pallas_src>

<mosaic_0001>
module attributes {stable_mosaic.version = 11 : i64} {
  func.func @linear_kernel(%arg0: memref<24x64xf32, #tpu.memory_space<vmem>>, %arg1: memref<64x96xf32, #tpu.memory_space<vmem>>, %arg2: memref<1x96xf32, #tpu.memory_space<vmem>>, %arg3: memref<24x96xf32, #tpu.memory_space<vmem>>) attributes {dimension_semantics = [], scalar_prefetch = 0 : i64, scratch_operands = 0 : i64, tpu.core_type = #tpu.core_type<tc>} {
    %c0 = arith.constant 0 : index
    %c0_0 = arith.constant 0 : index
    %0 = vector.load %arg0[%c0, %c0_0] : memref<24x64xf32, #tpu.memory_space<vmem>>, vector<24x64xf32>
    %c0_1 = arith.constant 0 : index
    %c0_2 = arith.constant 0 : index
    %1 = vector.load %arg1[%c0_1, %c0_2] : memref<64x96xf32, #tpu.memory_space<vmem>>, vector<64x96xf32>
    %cst = arith.constant dense<0.000000e+00> : vector<24x96xf32>
    %2 = tpu.matmul %0, %1, %cst {dimension_numbers = #tpu.dot_dimension_numbers<[1], [0], [0], [1], [0, 0, 1, 1], [], []>} : vector<24x64xf32>, vector<64x96xf32>, vector<24x96xf32> -> vector<24x96xf32>
    %c0_3 = arith.constant 0 : index
    %c0_4 = arith.constant 0 : index
    %3 = vector.load %arg2[%c0_3, %c0_4] : memref<1x96xf32, #tpu.memory_space<vmem>>, vector<1x96xf32>
    %4 = vector.broadcast %3 : vector<1x96xf32> to vector<24x96xf32>
    %5 = arith.addf %2, %4 : vector<24x96xf32>
    %c0_5 = arith.constant 0 : index
    %c0_6 = arith.constant 0 : index
    %6 = vector.load %arg3[%c0_5, %c0_6] : memref<24x96xf32, #tpu.memory_space<vmem>>, vector<24x96xf32>
    tpu.vector_store %arg3[%c0_5, %c0_6], %5 {strides = array<i32>} : memref<24x96xf32, #tpu.memory_space<vmem>>, vector<24x96xf32>,
    return
  }
}

module attributes {stable_mosaic.version = 11 : i64} {
  func.func @gated_attention_kernel(%arg0: i32, %arg1: memref<8x32xf32, #tpu.memory_space<vmem>>, %arg2: memref<1x8x32xf32, #tpu.memory_space<vmem>>, %arg3: memref<32x32xf32, #tpu.memory_space<vmem>>, %arg4: memref<32x32xf32, #tpu.memory_space<vmem>>, %arg5: memref<32x1xf32, #tpu.memory_space<vmem>>, %arg6: memref<64x64xf32, #tpu.memory_space<vmem>>, %arg7: memref<1x8x64xf32, #tpu.memory_space<vmem>>, %arg8: memref<8x32xf32, #tpu.memory_space<vmem>>) attributes {dimension_semantics = [#tpu.dimension_semantics<parallel>], iteration_bounds = array<i64: 3>, scalar_prefetch = 0 : i64, scratch_operands = 1 : i64, tpu.core_type = #tpu.core_type<tc>, window_params = [{pipeline_mode = #tpu.pipeline_mode<synchronous>, transform_indices = @transform_0, window_bounds = array<i64: 8, 32>}, {transform_indices = @transform_1, window_bounds = array<i64: 1, 8, 32>}, {pipeline_mode = #tpu.pipeline_mode<synchronous>, transform_indices = @transform_2, window_bounds = array<i64: 32, 32>}, {pipeline_mode = #tpu.pipeline_mode<synchronous>, transform_indices = @transform_3, window_bounds = array<i64: 32, 32>}, {pipeline_mode = #tpu.pipeline_mode<synchronous>, transform_indices = @transform_4, window_bounds = array<i64: 32, 1>}, {pipeline_mode = #tpu.pipeline_mode<synchronous>, transform_indices = @transform_5, window_bounds = array<i64: 64, 64>}, {transform_indices = @transform_6, window_bounds = array<i64: 1, 8, 64>}]} {
    %c0 = arith.constant 0 : index
    %c0_0 = arith.constant 0 : index
    %0 = vector.load %arg1[%c0, %c0_0] : memref<8x32xf32, #tpu.memory_space<vmem>>, vector<8x32xf32>
    %c0_1 = arith.constant 0 : index
    %c0_2 = arith.constant 0 : index
    %1 = vector.load %arg3[%c0_1, %c0_2] : memref<32x32xf32, #tpu.memory_space<vmem>>, vector<32x32xf32>
    %c0_3 = arith.constant 0 : index
    %c0_4 = arith.constant 0 : index
    %2 = vector.load %arg4[%c0_3, %c0_4] : memref<32x32xf32, #tpu.memory_space<vmem>>, vector<32x32xf32>
    %c0_5 = arith.constant 0 : index
    %c0_6 = arith.constant 0 : index
    %3 = vector.load %arg5[%c0_5, %c0_6] : memref<32x1xf32, #tpu.memory_space<vmem>>, vector<32x1xf32>
    %4 = vector.shape_cast %1 : vector<32x32xf32> to vector<1x32x32xf32>
    %5 = vector.shape_cast %0 : vector<8x32xf32> to vector<8x1x32xf32>
    %6 = vector.broadcast %4 : vector<1x32x32xf32> to vector<8x32x32xf32>
    %7 = vector.broadcast %5 : vector<8x1x32xf32> to vector<8x32x32xf32>
    %8 = arith.mulf %6, %7 : vector<8x32x32xf32>
    %c0_i32 = arith.constant 0 : i32
    %c8_i32 = arith.constant 8 : i32
    %9 = arith.addi %c0_i32, %c8_i32 : i32
    %c1_i32 = arith.constant 1 : i32
    scf.for %arg9 = %c0_i32 to %9 step %c1_i32  : i32 {
      %c0_21 = arith.constant 0 : index
      %27 = arith.index_cast %arg9 : i32 to index
      %c0_22 = arith.constant 0 : index
      %28 = vector.load %arg2[%c0_21, %27, %c0_22] : memref<1x8x32xf32, #tpu.memory_space<vmem>>, vector<1x1x32xf32>
      %29 = vector.shape_cast %28 : vector<1x1x32xf32> to vector<1x32xf32>
      %30 = vector.broadcast %29 : vector<1x32xf32> to vector<32x32xf32>
      %31 = arith.mulf %2, %30 : vector<32x32xf32>
      %32 = vector.shape_cast %31 : vector<32x32xf32> to vector<1x32x32xf32>
      %33 = vector.broadcast %32 : vector<1x32x32xf32> to vector<8x32x32xf32>
      %34 = arith.addf %8, %33 : vector<8x32x32xf32>
      %35 = math.tanh %34 : vector<8x32x32xf32>
      %36 = vector.shape_cast %3 : vector<32x1xf32> to vector<1x32x1xf32>
      %37 = vector.broadcast %36 : vector<1x32x1xf32> to vector<8x32x32xf32>
      %38 = arith.mulf %35, %37 : vector<8x32x32xf32>
      %cst_23 = arith.constant dense<0.000000e+00> : vector<8x32xf32>
      %39 = vector.multi_reduction <add>, %38, %cst_23 [1] : vector<8x32x32xf32> to vector<8x32xf32>
      %cst_24 = arith.constant dense<0xFF800000> : vector<8xf32>
      %40 = vector.multi_reduction <maximumf>, %39, %cst_24 [1] : vector<8x32xf32> to vector<8xf32>
      %41 = vector.shape_cast %40 : vector<8xf32> to vector<8x1xf32>
      %42 = vector.broadcast %41 : vector<8x1xf32> to vector<8x32xf32>
      %43 = arith.subf %39, %42 : vector<8x32xf32>
      %44 = math.exp %43 : vector<8x32xf32>
      %cst_25 = arith.constant dense<0.000000e+00> : vector<8xf32>
      %45 = vector.multi_reduction <add>, %44, %cst_25 [1] : vector<8x32xf32> to vector<8xf32>
      %46 = vector.shape_cast %45 : vector<8xf32> to vector<8x1xf32>
      %47 = vector.broadcast %46 : vector<8x1xf32> to vector<8x32xf32>
      %48 = arith.divf %44, %47 : vector<8x32xf32>
      %49 = arith.mulf %48, %0 : vector<8x32xf32>
      %cst_26 = arith.constant dense<0.000000e+00> : vector<32xf32>
      %50 = vector.multi_reduction <add>, %49, %cst_26 [0] : vector<8x32xf32> to vector<32xf32>
      %51 = vector.shape_cast %50 : vector<32xf32> to vector<1x32xf32>
      %52 = arith.index_cast %arg9 : i32 to index
      %c0_27 = arith.constant 0 : index
      %53 = vector.load %arg8[%52, %c0_27] : memref<8x32xf32, #tpu.memory_space<vmem>>, vector<1x32xf32>
      tpu.vector_store %arg8[%52, %c0_27], %51 {strides = array<i32>} : memref<8x32xf32, #tpu.memory_space<vmem>>, vector<1x32xf32>,
    }
    %c8_i32_7 = arith.constant 8 : i32
    %c0_8 = arith.constant 0 : index
    %c0_9 = arith.constant 0 : index
    %c0_10 = arith.constant 0 : index
    %10 = vector.load %arg2[%c0_8, %c0_9, %c0_10] : memref<1x8x32xf32, #tpu.memory_space<vmem>>, vector<1x8x32xf32>
    %11 = vector.shape_cast %10 : vector<1x8x32xf32> to vector<8x32xf32>
    %c0_11 = arith.constant 0 : index
    %c0_12 = arith.constant 0 : index
    %12 = vector.load %arg8[%c0_11, %c0_12] : memref<8x32xf32, #tpu.memory_space<vmem>>, vector<8x32xf32>
    %13 = tpu.concatenate %11, %12 in 1 : vector<8x32xf32>, vector<8x32xf32> -> vector<8x64xf32>
    %c0_13 = arith.constant 0 : index
    %c0_14 = arith.constant 0 : index
    %14 = vector.load %arg6[%c0_13, %c0_14] : memref<64x64xf32, #tpu.memory_space<vmem>>, vector<64x64xf32>
    %cst = arith.constant dense<0.000000e+00> : vector<8x64xf32>
    %15 = tpu.matmul %13, %14, %cst {dimension_numbers = #tpu.dot_dimension_numbers<[1], [0], [0], [1], [0, 0, 1, 1], [], []>} : vector<8x64xf32>, vector<64x64xf32>, vector<8x64xf32> -> vector<8x64xf32>
    %cst_15 = arith.constant 0.000000e+00 : f32
    %16 = vector.broadcast %cst_15 : f32 to vector<8x64xf32>
    %17 = arith.subf %16, %15 : vector<8x64xf32>
    %18 = math.exp %17 : vector<8x64xf32>
    %cst_16 = arith.constant 1.000000e+00 : f32
    %19 = vector.broadcast %cst_16 : f32 to vector<8x64xf32>
    %20 = arith.addf %19, %18 : vector<8x64xf32>
    %cst_17 = arith.constant 1.000000e+00 : f32
    %21 = vector.broadcast %cst_17 : f32 to vector<8x64xf32>
    %22 = arith.divf %21, %20 : vector<8x64xf32>
    %23 = arith.mulf %22, %13 : vector<8x64xf32>
    %c0_18 = arith.constant 0 : index
    %c0_19 = arith.constant 0 : index
    %c0_20 = arith.constant 0 : index
    %24 = vector.load %arg7[%c0_18, %c0_19, %c0_20] : memref<1x8x64xf32, #tpu.memory_space<vmem>>, vector<1x8x64xf32>
    %25 = vector.shape_cast %24 : vector<1x8x64xf32> to vector<8x64xf32>
    %26 = vector.shape_cast %23 : vector<8x64xf32> to vector<1x8x64xf32>
    tpu.vector_store %arg7[%c0_18, %c0_19, %c0_20], %26 {strides = array<i32>} : memref<1x8x64xf32, #tpu.memory_space<vmem>>, vector<1x8x64xf32>,
    return
  }
  func.func @transform_0(%arg0: i32) -> (i32, i32) {
    %c0_i32 = arith.constant 0 : i32
    %c0_i32_0 = arith.constant 0 : i32
    %c0_i32_1 = arith.constant 0 : i32
    return %c0_i32, %c0_i32_0 : i32, i32
  }
  func.func @transform_1(%arg0: i32) -> (i32, i32, i32) {
    %c0_i32 = arith.constant 0 : i32
    %c0_i32_0 = arith.constant 0 : i32
    %c0_i32_1 = arith.constant 0 : i32
    return %arg0, %c0_i32, %c0_i32_0 : i32, i32, i32
  }
  func.func @transform_2(%arg0: i32) -> (i32, i32) {
    %c0_i32 = arith.constant 0 : i32
    %c0_i32_0 = arith.constant 0 : i32
    %c0_i32_1 = arith.constant 0 : i32
    return %c0_i32, %c0_i32_0 : i32, i32
  }
  func.func @transform_3(%arg0: i32) -> (i32, i32) {
    %c0_i32 = arith.constant 0 : i32
    %c0_i32_0 = arith.constant 0 : i32
    %c0_i32_1 = arith.constant 0 : i32
    return %c0_i32, %c0_i32_0 : i32, i32
  }
  func.func @transform_4(%arg0: i32) -> (i32, i32) {
    %c0_i32 = arith.constant 0 : i32
    %c0_i32_0 = arith.constant 0 : i32
    %c0_i32_1 = arith.constant 0 : i32
    return %c0_i32, %c0_i32_0 : i32, i32
  }
  func.func @transform_5(%arg0: i32) -> (i32, i32) {
    %c0_i32 = arith.constant 0 : i32
    %c0_i32_0 = arith.constant 0 : i32
    %c0_i32_1 = arith.constant 0 : i32
    return %c0_i32, %c0_i32_0 : i32, i32
  }
  func.func @transform_6(%arg0: i32) -> (i32, i32, i32) {
    %c0_i32 = arith.constant 0 : i32
    %c0_i32_0 = arith.constant 0 : i32
    %c0_i32_1 = arith.constant 0 : i32
    return %arg0, %c0_i32, %c0_i32_0 : i32, i32, i32
  }
}

module attributes {stable_mosaic.version = 11 : i64} {
  func.func @gru_rec_kernel(%arg0: memref<8x3x32xf32, #tpu.memory_space<vmem>>, %arg1: memref<8x3x32xf32, #tpu.memory_space<vmem>>, %arg2: memref<8x3x32xf32, #tpu.memory_space<vmem>>, %arg3: memref<3x32xf32, #tpu.memory_space<vmem>>, %arg4: memref<32x32xf32, #tpu.memory_space<vmem>>, %arg5: memref<32x32xf32, #tpu.memory_space<vmem>>, %arg6: memref<32x32xf32, #tpu.memory_space<vmem>>, %arg7: memref<1x32xf32, #tpu.memory_space<vmem>>, %arg8: memref<8x3x32xf32, #tpu.memory_space<vmem>>) attributes {dimension_semantics = [], scalar_prefetch = 0 : i64, scratch_operands = 0 : i64, tpu.core_type = #tpu.core_type<tc>} {
    %c0 = arith.constant 0 : index
    %c0_0 = arith.constant 0 : index
    %0 = vector.load %arg4[%c0, %c0_0] : memref<32x32xf32, #tpu.memory_space<vmem>>, vector<32x32xf32>
    %c0_1 = arith.constant 0 : index
    %c0_2 = arith.constant 0 : index
    %1 = vector.load %arg5[%c0_1, %c0_2] : memref<32x32xf32, #tpu.memory_space<vmem>>, vector<32x32xf32>
    %c0_3 = arith.constant 0 : index
    %c0_4 = arith.constant 0 : index
    %2 = vector.load %arg6[%c0_3, %c0_4] : memref<32x32xf32, #tpu.memory_space<vmem>>, vector<32x32xf32>
    %c0_5 = arith.constant 0 : index
    %c0_6 = arith.constant 0 : index
    %3 = vector.load %arg7[%c0_5, %c0_6] : memref<1x32xf32, #tpu.memory_space<vmem>>, vector<1x32xf32>
    %c0_7 = arith.constant 0 : index
    %c0_8 = arith.constant 0 : index
    %4 = vector.load %arg3[%c0_7, %c0_8] : memref<3x32xf32, #tpu.memory_space<vmem>>, vector<3x32xf32>
    %c0_i32 = arith.constant 0 : i32
    %c8_i32 = arith.constant 8 : i32
    %5 = arith.addi %c0_i32, %c8_i32 : i32
    %c1_i32 = arith.constant 1 : i32
    %6 = scf.for %arg9 = %c0_i32 to %5 step %c1_i32 iter_args(%arg10 = %4) -> (vector<3x32xf32>)  : i32 {
      %cst = arith.constant dense<0.000000e+00> : vector<3x32xf32>
      %7 = tpu.matmul %arg10, %0, %cst {dimension_numbers = #tpu.dot_dimension_numbers<[1], [0], [0], [1], [0, 0, 1, 1], [], []>} : vector<3x32xf32>, vector<32x32xf32>, vector<3x32xf32> -> vector<3x32xf32>
      %cst_10 = arith.constant dense<0.000000e+00> : vector<3x32xf32>
      %8 = tpu.matmul %arg10, %1, %cst_10 {dimension_numbers = #tpu.dot_dimension_numbers<[1], [0], [0], [1], [0, 0, 1, 1], [], []>} : vector<3x32xf32>, vector<32x32xf32>, vector<3x32xf32> -> vector<3x32xf32>
      %cst_11 = arith.constant dense<0.000000e+00> : vector<3x32xf32>
      %9 = tpu.matmul %arg10, %2, %cst_11 {dimension_numbers = #tpu.dot_dimension_numbers<[1], [0], [0], [1], [0, 0, 1, 1], [], []>} : vector<3x32xf32>, vector<32x32xf32>, vector<3x32xf32> -> vector<3x32xf32>
      %10 = vector.broadcast %3 : vector<1x32xf32> to vector<3x32xf32>
      %11 = arith.addf %9, %10 : vector<3x32xf32>
      %12 = arith.index_cast %arg9 : i32 to index
      %c0_12 = arith.constant 0 : index
      %c0_13 = arith.constant 0 : index
      %13 = vector.load %arg0[%12, %c0_12, %c0_13] : memref<8x3x32xf32, #tpu.memory_space<vmem>>, vector<1x3x32xf32>
      %14 = vector.shape_cast %13 : vector<1x3x32xf32> to vector<3x32xf32>
      %15 = arith.addf %14, %7 : vector<3x32xf32>
      %cst_14 = arith.constant 0.000000e+00 : f32
      %16 = vector.broadcast %cst_14 : f32 to vector<3x32xf32>
      %17 = arith.subf %16, %15 : vector<3x32xf32>
      %18 = math.exp %17 : vector<3x32xf32>
      %cst_15 = arith.constant 1.000000e+00 : f32
      %19 = vector.broadcast %cst_15 : f32 to vector<3x32xf32>
      %20 = arith.addf %19, %18 : vector<3x32xf32>
      %cst_16 = arith.constant 1.000000e+00 : f32
      %21 = vector.broadcast %cst_16 : f32 to vector<3x32xf32>
      %22 = arith.divf %21, %20 : vector<3x32xf32>
      %23 = arith.index_cast %arg9 : i32 to index
      %c0_17 = arith.constant 0 : index
      %c0_18 = arith.constant 0 : index
      %24 = vector.load %arg1[%23, %c0_17, %c0_18] : memref<8x3x32xf32, #tpu.memory_space<vmem>>, vector<1x3x32xf32>
      %25 = vector.shape_cast %24 : vector<1x3x32xf32> to vector<3x32xf32>
      %26 = arith.addf %25, %8 : vector<3x32xf32>
      %cst_19 = arith.constant 0.000000e+00 : f32
      %27 = vector.broadcast %cst_19 : f32 to vector<3x32xf32>
      %28 = arith.subf %27, %26 : vector<3x32xf32>
      %29 = math.exp %28 : vector<3x32xf32>
      %cst_20 = arith.constant 1.000000e+00 : f32
      %30 = vector.broadcast %cst_20 : f32 to vector<3x32xf32>
      %31 = arith.addf %30, %29 : vector<3x32xf32>
      %cst_21 = arith.constant 1.000000e+00 : f32
      %32 = vector.broadcast %cst_21 : f32 to vector<3x32xf32>
      %33 = arith.divf %32, %31 : vector<3x32xf32>
      %34 = arith.index_cast %arg9 : i32 to index
      %c0_22 = arith.constant 0 : index
      %c0_23 = arith.constant 0 : index
      %35 = vector.load %arg2[%34, %c0_22, %c0_23] : memref<8x3x32xf32, #tpu.memory_space<vmem>>, vector<1x3x32xf32>
      %36 = vector.shape_cast %35 : vector<1x3x32xf32> to vector<3x32xf32>
      %37 = arith.mulf %22, %11 : vector<3x32xf32>
      %38 = arith.addf %36, %37 : vector<3x32xf32>
      %39 = math.tanh %38 : vector<3x32xf32>
      %cst_24 = arith.constant 1.000000e+00 : f32
      %40 = vector.broadcast %cst_24 : f32 to vector<3x32xf32>
      %41 = arith.subf %40, %33 : vector<3x32xf32>
      %42 = arith.mulf %41, %39 : vector<3x32xf32>
      %43 = arith.mulf %33, %arg10 : vector<3x32xf32>
      %44 = arith.addf %42, %43 : vector<3x32xf32>
      %45 = arith.index_cast %arg9 : i32 to index
      %c0_25 = arith.constant 0 : index
      %c0_26 = arith.constant 0 : index
      %46 = vector.load %arg8[%45, %c0_25, %c0_26] : memref<8x3x32xf32, #tpu.memory_space<vmem>>, vector<1x3x32xf32>
      %47 = vector.shape_cast %46 : vector<1x3x32xf32> to vector<3x32xf32>
      %48 = vector.shape_cast %44 : vector<3x32xf32> to vector<1x3x32xf32>
      tpu.vector_store %arg8[%45, %c0_25, %c0_26], %48 {strides = array<i32>} : memref<8x3x32xf32, #tpu.memory_space<vmem>>, vector<1x3x32xf32>,
      scf.yield %44 : vector<3x32xf32>
    }
    %c8_i32_9 = arith.constant 8 : i32
    return
  }
}

module attributes {stable_mosaic.version = 11 : i64} {
  func.func @tail_pre_kernel(%arg0: memref<24x32xf32, #tpu.memory_space<vmem>>, %arg1: memref<1x32xf32, #tpu.memory_space<vmem>>, %arg2: memref<32x32xf32, #tpu.memory_space<vmem>>, %arg3: memref<32x32xf32, #tpu.memory_space<vmem>>, %arg4: memref<32x1xf32, #tpu.memory_space<vmem>>, %arg5: memref<1x32xf32, #tpu.memory_space<vmem>>, %arg6: memref<32x32xf32, #tpu.memory_space<vmem>>, %arg7: memref<32x32xf32, #tpu.memory_space<vmem>>, %arg8: memref<32x64xf32, #tpu.memory_space<vmem>>, %arg9: memref<32x64xf32, #tpu.memory_space<vmem>>, %arg10: memref<64x1xf32, #tpu.memory_space<vmem>>, %arg11: memref<32x24xf32, #tpu.memory_space<vmem>>, %arg12: memref<1x24xf32, #tpu.memory_space<vmem>>, %arg13: memref<3x1xf32, #tpu.memory_space<vmem>>) attributes {dimension_semantics = [], scalar_prefetch = 0 : i64, scratch_operands = 0 : i64, tpu.core_type = #tpu.core_type<tc>} {
    %c0 = arith.constant 0 : index
    %c0_0 = arith.constant 0 : index
    %0 = vector.load %arg0[%c0, %c0_0] : memref<24x32xf32, #tpu.memory_space<vmem>>, vector<24x32xf32>
    %c0_1 = arith.constant 0 : index
    %c0_2 = arith.constant 0 : index
    %1 = vector.load %arg1[%c0_1, %c0_2] : memref<1x32xf32, #tpu.memory_space<vmem>>, vector<1x32xf32>
    %c0_3 = arith.constant 0 : index
    %c0_4 = arith.constant 0 : index
    %2 = vector.load %arg4[%c0_3, %c0_4] : memref<32x1xf32, #tpu.memory_space<vmem>>, vector<32x1xf32>
    %c0_5 = arith.constant 0 : index
    %c0_6 = arith.constant 0 : index
    %3 = vector.load %arg5[%c0_5, %c0_6] : memref<1x32xf32, #tpu.memory_space<vmem>>, vector<1x32xf32>
    %c0_7 = arith.constant 0 : index
    %c0_8 = arith.constant 0 : index
    %4 = vector.load %arg2[%c0_7, %c0_8] : memref<32x32xf32, #tpu.memory_space<vmem>>, vector<32x32xf32>
    %cst = arith.constant dense<0.000000e+00> : vector<32x24xf32>
    %5 = tpu.matmul %4, %0, %cst {dimension_numbers = #tpu.dot_dimension_numbers<[1], [1], [0], [0], [0, 0, 1, 0], [], []>} : vector<32x32xf32>, vector<24x32xf32>, vector<32x24xf32> -> vector<32x24xf32>
    %c0_9 = arith.constant 0 : index
    %c0_10 = arith.constant 0 : index
    %6 = vector.load %arg11[%c0_9, %c0_10] : memref<32x24xf32, #tpu.memory_space<vmem>>, vector<32x24xf32>
    tpu.vector_store %arg11[%c0_9, %c0_10], %5 {strides = array<i32>} : memref<32x24xf32, #tpu.memory_space<vmem>>, vector<32x24xf32>,
    %c0_11 = arith.constant 0 : index
    %c0_12 = arith.constant 0 : index
    %7 = vector.load %arg3[%c0_11, %c0_12] : memref<32x32xf32, #tpu.memory_space<vmem>>, vector<32x32xf32>
    %cst_13 = arith.constant dense<0.000000e+00> : vector<32x1xf32>
    %8 = tpu.matmul %7, %1, %cst_13 {dimension_numbers = #tpu.dot_dimension_numbers<[1], [1], [0], [0], [0, 0, 1, 0], [], []>} : vector<32x32xf32>, vector<1x32xf32>, vector<32x1xf32> -> vector<32x1xf32>
    %9 = vector.broadcast %8 : vector<32x1xf32> to vector<32x24xf32>
    %10 = arith.addf %5, %9 : vector<32x24xf32>
    %11 = math.tanh %10 : vector<32x24xf32>
    %cst_14 = arith.constant dense<0.000000e+00> : vector<1x24xf32>
    %12 = tpu.matmul %3, %11, %cst_14 {dimension_numbers = #tpu.dot_dimension_numbers<[1], [0], [0], [1], [0, 0, 1, 1], [], []>} : vector<1x32xf32>, vector<32x24xf32>, vector<1x24xf32> -> vector<1x24xf32>
    %c0_15 = arith.constant 0 : index
    %c0_16 = arith.constant 0 : index
    %13 = vector.load %arg12[%c0_15, %c0_16] : memref<1x24xf32, #tpu.memory_space<vmem>>, vector<1x24xf32>
    tpu.vector_store %arg12[%c0_15, %c0_16], %12 {strides = array<i32>} : memref<1x24xf32, #tpu.memory_space<vmem>>, vector<1x24xf32>,
    %c0_17 = arith.constant 0 : index
    %c0_18 = arith.constant 0 : index
    %14 = vector.load %arg7[%c0_17, %c0_18] : memref<32x32xf32, #tpu.memory_space<vmem>>, vector<32x32xf32>
    %cst_19 = arith.constant dense<0.000000e+00> : vector<1x32xf32>
    %15 = tpu.matmul %1, %14, %cst_19 {dimension_numbers = #tpu.dot_dimension_numbers<[1], [0], [0], [1], [0, 0, 1, 1], [], []>} : vector<1x32xf32>, vector<32x32xf32>, vector<1x32xf32> -> vector<1x32xf32>
    %c0_20 = arith.constant 0 : index
    %c0_21 = arith.constant 0 : index
    %16 = vector.load %arg6[%c0_20, %c0_21] : memref<32x32xf32, #tpu.memory_space<vmem>>, vector<32x32xf32>
    %cst_22 = arith.constant dense<0.000000e+00> : vector<24x32xf32>
    %17 = tpu.matmul %0, %16, %cst_22 {dimension_numbers = #tpu.dot_dimension_numbers<[1], [0], [0], [1], [0, 0, 1, 1], [], []>} : vector<24x32xf32>, vector<32x32xf32>, vector<24x32xf32> -> vector<24x32xf32>
    %18 = vector.broadcast %15 : vector<1x32xf32> to vector<24x32xf32>
    %19 = arith.addf %17, %18 : vector<24x32xf32>
    %20 = math.tanh %19 : vector<24x32xf32>
    %cst_23 = arith.constant dense<0.000000e+00> : vector<24x1xf32>
    %21 = tpu.matmul %20, %2, %cst_23 {dimension_numbers = #tpu.dot_dimension_numbers<[1], [0], [0], [1], [0, 0, 1, 1], [], []>} : vector<24x32xf32>, vector<32x1xf32>, vector<24x1xf32> -> vector<24x1xf32>
    %c0_24 = arith.constant 0 : index
    %c0_25 = arith.constant 0 : index
    %22 = vector.load %arg8[%c0_24, %c0_25] : memref<32x64xf32, #tpu.memory_space<vmem>>, vector<32x64xf32>
    %cst_26 = arith.constant dense<0.000000e+00> : vector<1x64xf32>
    %23 = tpu.matmul %1, %22, %cst_26 {dimension_numbers = #tpu.dot_dimension_numbers<[1], [0], [0], [1], [0, 0, 1, 1], [], []>} : vector<1x32xf32>, vector<32x64xf32>, vector<1x64xf32> -> vector<1x64xf32>
    %24 = vector.extract_strided_slice %21 {offsets = [0, 0], sizes = [8, 1], strides = [1, 1]} : vector<24x1xf32> to vector<8x1xf32>
    %cst_27 = arith.constant dense<0xFF800000> : vector<1xf32>
    %25 = vector.multi_reduction <maximumf>, %24, %cst_27 [0] : vector<8x1xf32> to vector<1xf32>
    %26 = vector.shape_cast %25 : vector<1xf32> to vector<1x1xf32>
    %27 = vector.broadcast %26 : vector<1x1xf32> to vector<8x1xf32>
    %28 = arith.subf %24, %27 : vector<8x1xf32>
    %29 = math.exp %28 : vector<8x1xf32>
    %cst_28 = arith.constant dense<0.000000e+00> : vector<1xf32>
    %30 = vector.multi_reduction <add>, %29, %cst_28 [0] : vector<8x1xf32> to vector<1xf32>
    %31 = vector.shape_cast %30 : vector<1xf32> to vector<1x1xf32>
    %32 = vector.broadcast %31 : vector<1x1xf32> to vector<8x1xf32>
    %33 = arith.divf %29, %32 : vector<8x1xf32>
    %34 = vector.extract_strided_slice %0 {offsets = [0, 0], sizes = [8, 32], strides = [1, 1]} : vector<24x32xf32> to vector<8x32xf32>
    %35 = vector.broadcast %33 : vector<8x1xf32> to vector<8x32xf32>
    %36 = arith.mulf %35, %34 : vector<8x32xf32>
    %cst_29 = arith.constant dense<0.000000e+00> : vector<32xf32>
    %37 = vector.multi_reduction <add>, %36, %cst_29 [0] : vector<8x32xf32> to vector<32xf32>
    %38 = vector.shape_cast %37 : vector<32xf32> to vector<1x32xf32>
    %39 = vector.extract_strided_slice %21 {offsets = [8, 0], sizes = [8, 1], strides = [1, 1]} : vector<24x1xf32> to vector<8x1xf32>
    %cst_30 = arith.constant dense<0xFF800000> : vector<1xf32>
    %40 = vector.multi_reduction <maximumf>, %39, %cst_30 [0] : vector<8x1xf32> to vector<1xf32>
    %41 = vector.shape_cast %40 : vector<1xf32> to vector<1x1xf32>
    %42 = vector.broadcast %41 : vector<1x1xf32> to vector<8x1xf32>
    %43 = arith.subf %39, %42 : vector<8x1xf32>
    %44 = math.exp %43 : vector<8x1xf32>
    %cst_31 = arith.constant dense<0.000000e+00> : vector<1xf32>
    %45 = vector.multi_reduction <add>, %44, %cst_31 [0] : vector<8x1xf32> to vector<1xf32>
    %46 = vector.shape_cast %45 : vector<1xf32> to vector<1x1xf32>
    %47 = vector.broadcast %46 : vector<1x1xf32> to vector<8x1xf32>
    %48 = arith.divf %44, %47 : vector<8x1xf32>
    %49 = vector.extract_strided_slice %0 {offsets = [8, 0], sizes = [8, 32], strides = [1, 1]} : vector<24x32xf32> to vector<8x32xf32>
    %50 = vector.broadcast %48 : vector<8x1xf32> to vector<8x32xf32>
    %51 = arith.mulf %50, %49 : vector<8x32xf32>
    %cst_32 = arith.constant dense<0.000000e+00> : vector<32xf32>
    %52 = vector.multi_reduction <add>, %51, %cst_32 [0] : vector<8x32xf32> to vector<32xf32>
    %53 = vector.shape_cast %52 : vector<32xf32> to vector<1x32xf32>
    %54 = vector.extract_strided_slice %21 {offsets = [16, 0], sizes = [8, 1], strides = [1, 1]} : vector<24x1xf32> to vector<8x1xf32>
    %cst_33 = arith.constant dense<0xFF800000> : vector<1xf32>
    %55 = vector.multi_reduction <maximumf>, %54, %cst_33 [0] : vector<8x1xf32> to vector<1xf32>
    %56 = vector.shape_cast %55 : vector<1xf32> to vector<1x1xf32>
    %57 = vector.broadcast %56 : vector<1x1xf32> to vector<8x1xf32>
    %58 = arith.subf %54, %57 : vector<8x1xf32>
    %59 = math.exp %58 : vector<8x1xf32>
    %cst_34 = arith.constant dense<0.000000e+00> : vector<1xf32>
    %60 = vector.multi_reduction <add>, %59, %cst_34 [0] : vector<8x1xf32> to vector<1xf32>
    %61 = vector.shape_cast %60 : vector<1xf32> to vector<1x1xf32>
    %62 = vector.broadcast %61 : vector<1x1xf32> to vector<8x1xf32>
    %63 = arith.divf %59, %62 : vector<8x1xf32>
    %64 = vector.extract_strided_slice %0 {offsets = [16, 0], sizes = [8, 32], strides = [1, 1]} : vector<24x32xf32> to vector<8x32xf32>
    %65 = vector.broadcast %63 : vector<8x1xf32> to vector<8x32xf32>
    %66 = arith.mulf %65, %64 : vector<8x32xf32>
    %cst_35 = arith.constant dense<0.000000e+00> : vector<32xf32>
    %67 = vector.multi_reduction <add>, %66, %cst_35 [0] : vector<8x32xf32> to vector<32xf32>
    %68 = vector.shape_cast %67 : vector<32xf32> to vector<1x32xf32>
    %69 = tpu.concatenate %38, %53, %68 in 0 : vector<1x32xf32>, vector<1x32xf32>, vector<1x32xf32> -> vector<3x32xf32>
    %c0_36 = arith.constant 0 : index
    %c0_37 = arith.constant 0 : index
    %70 = vector.load %arg9[%c0_36, %c0_37] : memref<32x64xf32, #tpu.memory_space<vmem>>, vector<32x64xf32>
    %cst_38 = arith.constant dense<0.000000e+00> : vector<3x64xf32>
    %71 = tpu.matmul %69, %70, %cst_38 {dimension_numbers = #tpu.dot_dimension_numbers<[1], [0], [0], [1], [0, 0, 1, 1], [], []>} : vector<3x32xf32>, vector<32x64xf32>, vector<3x64xf32> -> vector<3x64xf32>
    %72 = vector.broadcast %23 : vector<1x64xf32> to vector<3x64xf32>
    %73 = arith.addf %72, %71 : vector<3x64xf32>
    %74 = math.tanh %73 : vector<3x64xf32>
    %c0_39 = arith.constant 0 : index
    %c0_40 = arith.constant 0 : index
    %75 = vector.load %arg10[%c0_39, %c0_40] : memref<64x1xf32, #tpu.memory_space<vmem>>, vector<64x1xf32>
    %cst_41 = arith.constant dense<0.000000e+00> : vector<3x1xf32>
    %76 = tpu.matmul %74, %75, %cst_41 {dimension_numbers = #tpu.dot_dimension_numbers<[1], [0], [0], [1], [0, 0, 1, 1], [], []>} : vector<3x64xf32>, vector<64x1xf32>, vector<3x1xf32> -> vector<3x1xf32>
    %c0_42 = arith.constant 0 : index
    %c0_43 = arith.constant 0 : index
    %77 = vector.load %arg13[%c0_42, %c0_43] : memref<3x1xf32, #tpu.memory_space<vmem>>, vector<3x1xf32>
    tpu.vector_store %arg13[%c0_42, %c0_43], %76 {strides = array<i32>} : memref<3x1xf32, #tpu.memory_space<vmem>>, vector<3x1xf32>,
    return
  }
}

module attributes {stable_mosaic.version = 11 : i64} {
  func.func @linear_kernel(%arg0: memref<24x32xf32, #tpu.memory_space<vmem>>, %arg1: memref<32x96xf32, #tpu.memory_space<vmem>>, %arg2: memref<1x96xf32, #tpu.memory_space<vmem>>, %arg3: memref<24x96xf32, #tpu.memory_space<vmem>>) attributes {dimension_semantics = [], scalar_prefetch = 0 : i64, scratch_operands = 0 : i64, tpu.core_type = #tpu.core_type<tc>} {
    %c0 = arith.constant 0 : index
    %c0_0 = arith.constant 0 : index
    %0 = vector.load %arg0[%c0, %c0_0] : memref<24x32xf32, #tpu.memory_space<vmem>>, vector<24x32xf32>
    %c0_1 = arith.constant 0 : index
    %c0_2 = arith.constant 0 : index
    %1 = vector.load %arg1[%c0_1, %c0_2] : memref<32x96xf32, #tpu.memory_space<vmem>>, vector<32x96xf32>
    %cst = arith.constant dense<0.000000e+00> : vector<24x96xf32>
    %2 = tpu.matmul %0, %1, %cst {dimension_numbers = #tpu.dot_dimension_numbers<[1], [0], [0], [1], [0, 0, 1, 1], [], []>} : vector<24x32xf32>, vector<32x96xf32>, vector<24x96xf32> -> vector<24x96xf32>
    %c0_3 = arith.constant 0 : index
    %c0_4 = arith.constant 0 : index
    %3 = vector.load %arg2[%c0_3, %c0_4] : memref<1x96xf32, #tpu.memory_space<vmem>>, vector<1x96xf32>
    %4 = vector.broadcast %3 : vector<1x96xf32> to vector<24x96xf32>
    %5 = arith.addf %2, %4 : vector<24x96xf32>
    %c0_5 = arith.constant 0 : index
    %c0_6 = arith.constant 0 : index
    %6 = vector.load %arg3[%c0_5, %c0_6] : memref<24x96xf32, #tpu.memory_space<vmem>>, vector<24x96xf32>
    tpu.vector_store %arg3[%c0_5, %c0_6], %5 {strides = array<i32>} : memref<24x96xf32, #tpu.memory_space<vmem>>, vector<24x96xf32>,
    return
  }
}

module attributes {stable_mosaic.version = 11 : i64} {
  func.func @gru_rec_kernel(%arg0: memref<24x1x32xf32, #tpu.memory_space<vmem>>, %arg1: memref<24x1x32xf32, #tpu.memory_space<vmem>>, %arg2: memref<24x1x32xf32, #tpu.memory_space<vmem>>, %arg3: memref<1x32xf32, #tpu.memory_space<vmem>>, %arg4: memref<32x32xf32, #tpu.memory_space<vmem>>, %arg5: memref<32x32xf32, #tpu.memory_space<vmem>>, %arg6: memref<32x32xf32, #tpu.memory_space<vmem>>, %arg7: memref<1x32xf32, #tpu.memory_space<vmem>>, %arg8: memref<24x1x32xf32, #tpu.memory_space<vmem>>) attributes {dimension_semantics = [], scalar_prefetch = 0 : i64, scratch_operands = 0 : i64, tpu.core_type = #tpu.core_type<tc>} {
    %c0 = arith.constant 0 : index
    %c0_0 = arith.constant 0 : index
    %0 = vector.load %arg4[%c0, %c0_0] : memref<32x32xf32, #tpu.memory_space<vmem>>, vector<32x32xf32>
    %c0_1 = arith.constant 0 : index
    %c0_2 = arith.constant 0 : index
    %1 = vector.load %arg5[%c0_1, %c0_2] : memref<32x32xf32, #tpu.memory_space<vmem>>, vector<32x32xf32>
    %c0_3 = arith.constant 0 : index
    %c0_4 = arith.constant 0 : index
    %2 = vector.load %arg6[%c0_3, %c0_4] : memref<32x32xf32, #tpu.memory_space<vmem>>, vector<32x32xf32>
    %c0_5 = arith.constant 0 : index
    %c0_6 = arith.constant 0 : index
    %3 = vector.load %arg7[%c0_5, %c0_6] : memref<1x32xf32, #tpu.memory_space<vmem>>, vector<1x32xf32>
    %c0_7 = arith.constant 0 : index
    %c0_8 = arith.constant 0 : index
    %4 = vector.load %arg3[%c0_7, %c0_8] : memref<1x32xf32, #tpu.memory_space<vmem>>, vector<1x32xf32>
    %c0_i32 = arith.constant 0 : i32
    %c24_i32 = arith.constant 24 : i32
    %5 = arith.addi %c0_i32, %c24_i32 : i32
    %c1_i32 = arith.constant 1 : i32
    %6 = scf.for %arg9 = %c0_i32 to %5 step %c1_i32 iter_args(%arg10 = %4) -> (vector<1x32xf32>)  : i32 {
      %cst = arith.constant dense<0.000000e+00> : vector<1x32xf32>
      %7 = tpu.matmul %arg10, %0, %cst {dimension_numbers = #tpu.dot_dimension_numbers<[1], [0], [0], [1], [0, 0, 1, 1], [], []>} : vector<1x32xf32>, vector<32x32xf32>, vector<1x32xf32> -> vector<1x32xf32>
      %cst_10 = arith.constant dense<0.000000e+00> : vector<1x32xf32>
      %8 = tpu.matmul %arg10, %1, %cst_10 {dimension_numbers = #tpu.dot_dimension_numbers<[1], [0], [0], [1], [0, 0, 1, 1], [], []>} : vector<1x32xf32>, vector<32x32xf32>, vector<1x32xf32> -> vector<1x32xf32>
      %cst_11 = arith.constant dense<0.000000e+00> : vector<1x32xf32>
      %9 = tpu.matmul %arg10, %2, %cst_11 {dimension_numbers = #tpu.dot_dimension_numbers<[1], [0], [0], [1], [0, 0, 1, 1], [], []>} : vector<1x32xf32>, vector<32x32xf32>, vector<1x32xf32> -> vector<1x32xf32>
      %10 = arith.addf %9, %3 : vector<1x32xf32>
      %11 = arith.index_cast %arg9 : i32 to index
      %c0_12 = arith.constant 0 : index
      %c0_13 = arith.constant 0 : index
      %12 = vector.load %arg0[%11, %c0_12, %c0_13] : memref<24x1x32xf32, #tpu.memory_space<vmem>>, vector<1x1x32xf32>
      %13 = vector.shape_cast %12 : vector<1x1x32xf32> to vector<1x32xf32>
      %14 = arith.addf %13, %7 : vector<1x32xf32>
      %cst_14 = arith.constant 0.000000e+00 : f32
      %15 = vector.broadcast %cst_14 : f32 to vector<1x32xf32>
      %16 = arith.subf %15, %14 : vector<1x32xf32>
      %17 = math.exp %16 : vector<1x32xf32>
      %cst_15 = arith.constant 1.000000e+00 : f32
      %18 = vector.broadcast %cst_15 : f32 to vector<1x32xf32>
      %19 = arith.addf %18, %17 : vector<1x32xf32>
      %cst_16 = arith.constant 1.000000e+00 : f32
      %20 = vector.broadcast %cst_16 : f32 to vector<1x32xf32>
      %21 = arith.divf %20, %19 : vector<1x32xf32>
      %22 = arith.index_cast %arg9 : i32 to index
      %c0_17 = arith.constant 0 : index
      %c0_18 = arith.constant 0 : index
      %23 = vector.load %arg1[%22, %c0_17, %c0_18] : memref<24x1x32xf32, #tpu.memory_space<vmem>>, vector<1x1x32xf32>
      %24 = vector.shape_cast %23 : vector<1x1x32xf32> to vector<1x32xf32>
      %25 = arith.addf %24, %8 : vector<1x32xf32>
      %cst_19 = arith.constant 0.000000e+00 : f32
      %26 = vector.broadcast %cst_19 : f32 to vector<1x32xf32>
      %27 = arith.subf %26, %25 : vector<1x32xf32>
      %28 = math.exp %27 : vector<1x32xf32>
      %cst_20 = arith.constant 1.000000e+00 : f32
      %29 = vector.broadcast %cst_20 : f32 to vector<1x32xf32>
      %30 = arith.addf %29, %28 : vector<1x32xf32>
      %cst_21 = arith.constant 1.000000e+00 : f32
      %31 = vector.broadcast %cst_21 : f32 to vector<1x32xf32>
      %32 = arith.divf %31, %30 : vector<1x32xf32>
      %33 = arith.index_cast %arg9 : i32 to index
      %c0_22 = arith.constant 0 : index
      %c0_23 = arith.constant 0 : index
      %34 = vector.load %arg2[%33, %c0_22, %c0_23] : memref<24x1x32xf32, #tpu.memory_space<vmem>>, vector<1x1x32xf32>
      %35 = vector.shape_cast %34 : vector<1x1x32xf32> to vector<1x32xf32>
      %36 = arith.mulf %21, %10 : vector<1x32xf32>
      %37 = arith.addf %35, %36 : vector<1x32xf32>
      %38 = math.tanh %37 : vector<1x32xf32>
      %cst_24 = arith.constant 1.000000e+00 : f32
      %39 = vector.broadcast %cst_24 : f32 to vector<1x32xf32>
      %40 = arith.subf %39, %32 : vector<1x32xf32>
      %41 = arith.mulf %40, %38 : vector<1x32xf32>
      %42 = arith.mulf %32, %arg10 : vector<1x32xf32>
      %43 = arith.addf %41, %42 : vector<1x32xf32>
      %44 = arith.index_cast %arg9 : i32 to index
      %c0_25 = arith.constant 0 : index
      %c0_26 = arith.constant 0 : index
      %45 = vector.load %arg8[%44, %c0_25, %c0_26] : memref<24x1x32xf32, #tpu.memory_space<vmem>>, vector<1x1x32xf32>
      %46 = vector.shape_cast %45 : vector<1x1x32xf32> to vector<1x32xf32>
      %47 = vector.shape_cast %43 : vector<1x32xf32> to vector<1x1x32xf32>
      tpu.vector_store %arg8[%44, %c0_25, %c0_26], %47 {strides = array<i32>} : memref<24x1x32xf32, #tpu.memory_space<vmem>>, vector<1x1x32xf32>,
      scf.yield %43 : vector<1x32xf32>
    }
    %c24_i32_9 = arith.constant 24 : i32
    return
  }
}

module attributes {stable_mosaic.version = 11 : i64} {
  func.func @tail_end_kernel(%arg0: memref<32x24xf32, #tpu.memory_space<vmem>>, %arg1: memref<1x32xf32, #tpu.memory_space<vmem>>, %arg2: memref<32x32xf32, #tpu.memory_space<vmem>>, %arg3: memref<1x32xf32, #tpu.memory_space<vmem>>, %arg4: memref<1x24xf32, #tpu.memory_space<vmem>>) attributes {dimension_semantics = [], scalar_prefetch = 0 : i64, scratch_operands = 0 : i64, tpu.core_type = #tpu.core_type<tc>} {
    %c0 = arith.constant 0 : index
    %c0_0 = arith.constant 0 : index
    %0 = vector.load %arg2[%c0, %c0_0] : memref<32x32xf32, #tpu.memory_space<vmem>>, vector<32x32xf32>
    %c0_1 = arith.constant 0 : index
    %c0_2 = arith.constant 0 : index
    %1 = vector.load %arg1[%c0_1, %c0_2] : memref<1x32xf32, #tpu.memory_space<vmem>>, vector<1x32xf32>
    %cst = arith.constant dense<0.000000e+00> : vector<32x1xf32>
    %2 = tpu.matmul %0, %1, %cst {dimension_numbers = #tpu.dot_dimension_numbers<[1], [1], [0], [0], [0, 0, 1, 0], [], []>} : vector<32x32xf32>, vector<1x32xf32>, vector<32x1xf32> -> vector<32x1xf32>
    %c0_3 = arith.constant 0 : index
    %c0_4 = arith.constant 0 : index
    %3 = vector.load %arg3[%c0_3, %c0_4] : memref<1x32xf32, #tpu.memory_space<vmem>>, vector<1x32xf32>
    %c0_5 = arith.constant 0 : index
    %c0_6 = arith.constant 0 : index
    %4 = vector.load %arg0[%c0_5, %c0_6] : memref<32x24xf32, #tpu.memory_space<vmem>>, vector<32x24xf32>
    %5 = vector.broadcast %2 : vector<32x1xf32> to vector<32x24xf32>
    %6 = arith.addf %4, %5 : vector<32x24xf32>
    %7 = math.tanh %6 : vector<32x24xf32>
    %cst_7 = arith.constant dense<0.000000e+00> : vector<1x24xf32>
    %8 = tpu.matmul %3, %7, %cst_7 {dimension_numbers = #tpu.dot_dimension_numbers<[1], [0], [0], [1], [0, 0, 1, 1], [], []>} : vector<1x32xf32>, vector<32x24xf32>, vector<1x24xf32> -> vector<1x24xf32>
    %c0_8 = arith.constant 0 : index
    %c0_9 = arith.constant 0 : index
    %9 = vector.load %arg4[%c0_8, %c0_9] : memref<1x24xf32, #tpu.memory_space<vmem>>, vector<1x24xf32>
    tpu.vector_store %arg4[%c0_8, %c0_9], %8 {strides = array<i32>} : memref<1x24xf32, #tpu.memory_space<vmem>>, vector<1x24xf32>,
    return
  }
}

</mosaic_0001>

<bundles_post_ra>
// kernel: evidence_extractor_forward.8
= control target key start
LH: loop header
LB: loop body
LE: loop exit
PB: predicated region body
PF: predicated region fallthrough
CT: control target
= control target key end

     0   :  { %vm29_vm0 = vcmask 523264   ;;  %vm65_vm1 = vcmask 785408   ;;  %s158_s1 = inlined_call_operand.vmem [shape: f32[64,96], index: 1, kind: input, shape index: {}]   ;;  %s159_s2 = inlined_call_operand.vmem [shape: f32[1,96], index: 2, kind: input, shape index: {}]   ;;  %s160_s0 = inlined_call_operand.vmem [shape: f32[24,64], index: 0, kind: input, shape index: {}]   ;;  %s161_s3 = inlined_call_operand.vmem [shape: f32[24,96], index: 3, kind: output, shape index: {}]  }
   0x1   :  { %v24_v0 = vld [vmem:[%s158_s1 + $0x38] sm:$0xff]  ;;  %v23_v1 = vld [vmem:[%s158_s1 + $0x30] sm:$0xff]  ;;  %v22_v2 = vld [vmem:[%s158_s1 + $0x28] sm:$0xff] }
   0x2   :  { %77 = vmatpush.msra.mxu2 %v24_v0  ;;  %47 = vmatpush.msra.mxu0 %v24_v0  ;;  %v21_v3 = vld [vmem:[%s158_s1 + $0x20] sm:$0xff]  ;;  %v20_v4 = vld [vmem:[%s158_s1 + $0x18] sm:$0xff]  ;;  %v19_v5 = vld [vmem:[%s158_s1 + $0x10] sm:$0xff] }
   0x3   :  { %76 = vmatpush.msra.mxu1 %v24_v0  ;;  %v18_v6 = vld [vmem:[%s158_s1 + $0x8] sm:$0xff]  ;;  %v17_v7 = vld [vmem:[%s158_s1] sm:$0xff]  ;;  %v16_v8 = vld [vmem:[%s160_s0 + $0x10] sm:$0xff] }
   0x4   :  { %79 = vmatpush.msra.mxu2 %v23_v1  ;;  %48 = vmatpush.msra.mxu0 %v23_v1  ;;  %v14_v9 = vld [vmem:[%s160_s0] sm:$0xff]  ;;  %v15_v10 = vld [vmem:[%s160_s0 + $0x8] sm:$0xff] }
   0x5   :  { %78 = vmatpush.msra.mxu1 %v23_v1  ;;  %v92_v11 = vld [vmem:[%s159_s2] ss:$0 sm:$0xff] }
   0x6   :  { %81 = vmatpush.msra.mxu2 %v22_v2  ;;  %49 = vmatpush.msra.mxu0 %v22_v2 }
   0x7   :  { %80 = vmatpush.msra.mxu1 %v22_v2 }
   0x8   :  { %83 = vmatpush.msra.mxu2 %v21_v3  ;;  %50 = vmatpush.msra.mxu0 %v21_v3 }
   0x9   :  { %82 = vmatpush.msra.mxu1 %v21_v3 }
   0xa   :  { %85 = vmatpush.msra.mxu2 %v20_v4  ;;  %51 = vmatpush.msra.mxu0 %v20_v4 }
   0xb   :  { %84 = vmatpush.msra.mxu1 %v20_v4 }
   0xc   :  { %87 = vmatpush.msra.mxu2 %v19_v5  ;;  %52 = vmatpush.msra.mxu0 %v19_v5 }
   0xd   :  { %86 = vmatpush.msra.mxu1 %v19_v5 }
   0xe   :  { %89 = vmatpush.msra.mxu2 %v18_v6  ;;  %53 = vmatpush.msra.mxu0 %v18_v6 }
   0xf   :  { %88 = vmatpush.msra.mxu1 %v18_v6 }
  0x10   :  { %91 = vmatpush.msra.mxu2 %v17_v7  ;;  %54 = vmatpush.msra.mxu0 %v17_v7 }
  0x11   :  { %75 = vmatmul.msk.f32.vlgmr.msra.gmra.mxu2 %vm29_vm0, %v16_v8  ;;  %90 = vmatpush.msra.mxu1 %v17_v7 }
  0x12   :  { %73 = vmatmul.msk.f32.vlgmr.msra.gmra.mxu0 %vm29_vm0, %v14_v9  ;;  %74 = vmatmul.msk.f32.vlgmr.msra.gmra.mxu1 %vm29_vm0, %v15_v10 }
  0x8f   :  { %v56_v12 = vpop.f32.mrf.mxu0  ;;  %v59_v13 = vpop.f32.mrf.mxu1 }
  0x90   :  { %v57_v14 = vadd.f32 %v92_v11, %v56_v12  ;;  %v60_v15 = vadd.f32 %v92_v11, %v59_v13 }
  0x92   :  { %66 = vst.msk [vmem:[%s161_s3] sm:$0xff] %vm65_vm1, %v57_v14 }
  0x93   :  { %67 = vst.msk [vmem:[%s161_s3 + $0x8] sm:$0xff] %vm65_vm1, %v60_v15 }
  0x94   :  { %v62_v16 = vpop.f32.mrf.mxu2 }
  0x95   :  { %v63_v17 = vadd.f32 %v92_v11, %v62_v16 }
  0x97   :  { %68 = vst.msk [vmem:[%s161_s3 + $0x10] sm:$0xff] %vm65_vm1, %v63_v17 }

// kernel: evidence_extractor_forward.9
= control target key start
LH: loop header
LB: loop body
LE: loop exit
PB: predicated region body
PF: predicated region fallthrough
CT: control target
= control target key end

     0   :  { %s355_s9 = smov 0   ;;  %s404_s0 = inlined_call_operand.vmem [shape: f32[8,3,32], index: 0, kind: input, shape index: {}]   ;;  %s405_s1 = inlined_call_operand.vmem [shape: f32[8,3,32], index: 1, kind: input, shape index: {}]   ;;  %s406_s2 = inlined_call_operand.vmem [shape: f32[8,3,32], index: 2, kind: input, shape index: {}]   ;;  %s407_s4 = inlined_call_operand.vmem [shape: f32[32,32], index: 4, kind: input, shape index: {}]   ;;  %s408_s5 = inlined_call_operand.vmem [shape: f32[32,32], index: 5, kind: input, shape index: {}]   ;;  %s409_s6 = inlined_call_operand.vmem [shape: f32[32,32], index: 6, kind: input, shape index: {}]   ;;  %s410_s8 = inlined_call_operand.vmem [shape: f32[8,3,32], index: 8, kind: output, shape index: {}]   ;;  %s411_s3 = inlined_call_operand.vmem [shape: f32[3,32], index: 3, kind: input, shape index: {}]   ;;  %s412_s7 = inlined_call_operand.vmem [shape: f32[1,32], index: 7, kind: input, shape index: {}]  }
   0x1   :  { %v288_v0 = vld [vmem:[%s407_s4] sm:$0xff]  ;;  %v293_v1 = vld [vmem:[%s407_s4 + $0x8] sm:$0xff]  ;;  %v298_v2 = vld [vmem:[%s407_s4 + $0x10] sm:$0xff] }
   0x2   :  { %v303_v3 = vld [vmem:[%s407_s4 + $0x18] sm:$0xff]  ;;  %v308_v4 = vld [vmem:[%s408_s5] sm:$0xff]  ;;  %v313_v5 = vld [vmem:[%s408_s5 + $0x8] sm:$0xff] }
   0x3   :  { %v318_v6 = vld [vmem:[%s408_s5 + $0x10] sm:$0xff]  ;;  %v323_v7 = vld [vmem:[%s408_s5 + $0x18] sm:$0xff]  ;;  %v328_v8 = vld [vmem:[%s409_s6] sm:$0xff] }
   0x4   :  { %v333_v9 = vld [vmem:[%s409_s6 + $0x8] sm:$0xff]  ;;  %v338_v10 = vld [vmem:[%s409_s6 + $0x10] sm:$0xff]  ;;  %v343_v11 = vld [vmem:[%s409_s6 + $0x18] sm:$0xff] }
   0x5   :  { %v348_v12 = vld [vmem:[%s412_s7] sm:$0x1] }
   0x6   :  { %v42_v13 = vld [vmem:[%s411_s3] sm:$0x7]  }
   0x7 LB: > { %66 = vmatpush.msra.mxu0 %v303_v3  ;;  %86 = vmatpush.msra.mxu1 %v323_v7  ;;  %vm50_vm0 = vcmask 261120   ;;  %s379_s3 = sshll.u32 %s238_s9, 2  ;;  %v95_v32 = vperm.slane %v348_v12, 0  ;;  %vm172_vm9 = vcmask 256000   ;;  %s48_s9 = sadd.s32 1, %s238_s9   ;;  %s238_s9 = sphi %s355_s9, %s48_s9   ;;  %v234_v13 = vphi %v42_v13, %v170_v13  }
   0x8   : > { %109 = vmatpush.msra.mxu2 %v343_v11  ;;  %s118_s10 = scalar_lea.vmem %s404_s0, %s379_s3  ;;  %s140_s13 = scalar_lea.vmem %s405_s1, %s379_s3 }
   0x9   : > { %67 = vmatpush.msra.mxu0 %v298_v2  ;;  %87 = vmatpush.msra.mxu1 %v318_v6  ;;  %v119_v14 = vld [vmem:[%s118_s10] sm:$0x7]  ;;  %s162_s16 = scalar_lea.vmem %s406_s2, %s379_s3  ;;  %s171_s19 = scalar_lea.vmem %s410_s8, %s379_s3 }
   0xa   : > { %110 = vmatpush.msra.mxu2 %v338_v10  ;;  %v141_v15 = vld [vmem:[%s140_s13] sm:$0x7]  ;;  %p45_p0 = scmp.ge.s32.totalorder %s48_s9, 8  }
   0xb   : > { %68 = vmatpush.msra.mxu0 %v293_v1  ;;  %88 = vmatpush.msra.mxu1 %v313_v5  ;;  %v163_v46 = vld [vmem:[%s162_s16] sm:$0x7] }
   0xc   : > { %111 = vmatpush.msra.mxu2 %v333_v9 }
   0xd   : > { %69 = vmatpush.msra.mxu0 %v288_v0  ;;  %89 = vmatpush.msra.mxu1 %v308_v4 }
   0xe   : > { %194 = vmatmul.msk.f32.vlgmr.msra.gmra.mxu0 %vm50_vm0, %v234_v13  ;;  %195 = vmatmul.msk.f32.vlgmr.msra.gmra.mxu1 %vm50_vm0, %v234_v13 }
   0xf   : > { %112 = vmatpush.msra.mxu2 %v328_v8 }
  0x10   : > { %196 = vmatmul.msk.f32.vlgmr.msra.gmra.mxu2 %vm50_vm0, %v234_v13 }
  0x8b   : > { %v71_v16 = vpop.f32.mrf.mxu0  ;;  %v91_v17 = vpop.f32.mrf.mxu1 }
  0x8c   : > { %v120_v18 = vadd.f32 %v119_v14, %v71_v16  ;;  %v142_v19 = vadd.f32 %v141_v15, %v91_v17 }
  0x8e   : > { %v121_v20 = vsub.f32 0.0, %v120_v18  ;;  %v143_v21 = vsub.f32 0.0, %v142_v19 }
  0x90   : > { %v122_v22 = vmul.f32 1.442695, %v121_v20  ;;  %v144_v23 = vmul.f32 1.442695, %v143_v21 }
  0x92   : > { %214 = vpow2.f32 %v122_v22 }
  0x93   : > { %216 = vpow2.f32 %v144_v23  ;;  %v114_v35 = vpop.f32.mrf.mxu2 }
  0x94   : > { %v115_v40 = vadd.f32 %v114_v35, %v95_v32 }
  0x98   : > { %v215_v24 = vpop.eup %214 }
  0x99   : > { %v217_v25 = vpop.eup %216  ;;  %v124_v26 = vadd.f32 1.0, %v215_v24 }
  0x9a   : > { %v146_v27 = vadd.f32 1.0, %v217_v25 }
  0x9b   : > { %218 = vrcp.f32 %v124_v26  ;;  %v136_v36 = vand.u32 2147483648, %v124_v26  ;;  %v134_v38 = vand.u32 2147483647, %v124_v26  ;;  %vm130_vm2 = vweird.f32 %v124_v26 }
  0x9c   : > { %220 = vrcp.f32 %v146_v27  ;;  %vm152_vm5 = vweird.f32 %v146_v27  ;;  %v158_v47 = vand.u32 2147483648, %v146_v27  ;;  %v156_v49 = vand.u32 2147483647, %v146_v27 }
  0x9d   : > { %v137_v42 = vor.u32 1.1754944e-38, %v136_v36  ;;  %vm135_vm4 = vcmp.eq.f32.partialorder %v134_v38, 8.507059e+37 }
  0x9e   : > { %v159_v52 = vor.u32 1.1754944e-38, %v158_v47  ;;  %vm157_vm8 = vcmp.eq.f32.partialorder %v156_v49, 8.507059e+37 }
  0xa1   : > { %v219_v28 = vpop.eup %218 }
  0xa2   : > { %v221_v29 = vpop.eup %220  ;;  %v126_v30 = vmul.f32 %v219_v28, %v124_v26  ;;  %vm131_vm1 = vweird.f32 %v219_v28 }
  0xa3   : > { %v148_v31 = vmul.f32 %v221_v29, %v146_v27  ;;  %vm132_vm3 = vmor %vm130_vm2, %vm131_vm1  ;;  %vm153_vm6 = vweird.f32 %v221_v29 }
  0xa4   : > { %v127_v33 = vsub.f32 1.0, %v126_v30  ;;  %vm154_vm7 = vmor %vm152_vm5, %vm153_vm6 }
  0xa5   : > { %v149_v34 = vsub.f32 1.0, %v148_v31 }
  0xa6   : > { %v128_v37 = vmul.f32 %v219_v28, %v127_v33 }
  0xa7   : > { %v150_v39 = vmul.f32 %v221_v29, %v149_v34 }
  0xa8   : > { %v129_v41 = vadd.f32 %v219_v28, %v128_v37 }
  0xa9   : > { %v151_v44 = vadd.f32 %v221_v29, %v150_v39 }
  0xaa   : > { %v133_v43 = vsel %vm132_vm3, %v219_v28, %v129_v41 }
  0xab   : > { %v138_v45 = vsel %vm135_vm4, %v137_v42, %v133_v43  ;;  %v155_v51 = vsel %vm154_vm7, %v221_v29, %v151_v44 }
  0xac   : > { %v164_v48 = vmul.f32 %v138_v45, %v115_v40  ;;  %v160_v53 = vsel %vm157_vm8, %v159_v52, %v155_v51 }
  0xad   : > { %v167_v54 = vsub.f32 1.0, %v160_v53  ;;  %v169_v57 = vmul.f32 %v234_v13, %v160_v53 }
  0xae   : > { %v165_v50 = vadd.f32 %v164_v48, %v163_v46 }
  0xb0   : > { %222 = vtanh.f32 %v165_v50 }
  0xb6   : > { %v223_v55 = vpop.eup %222 }
  0xb7   : > { %v168_v56 = vmul.f32 %v223_v55, %v167_v54  ;;  %47 = sbr.rel (!%p45_p0) target bundleno = 7 (0x7), region = 63 }
  0xb9   : > { %v170_v13 = vadd.f32 %v169_v57, %v168_v56  }
  0xbb   : > { %173 = vst.msk [vmem:[%s171_s19] sm:$0x7] %vm172_vm9, %v170_v13 }

// kernel: evidence_extractor_forward.7
= control target key start
LH: loop header
LB: loop body
LE: loop exit
PB: predicated region body
PF: predicated region fallthrough
CT: control target
= control target key end

     0   :  { %s1132_s21 = smov 0   ;;  %s1681_s0 = inlined_call_operand.vmem [shape: f32[8,32], index: 0, kind: input, shape index: {}]   ;;  %s1682_s1 = inlined_call_operand.vmem [shape: f32[3,8,32], index: 1, kind: input, shape index: {}]   ;;  %s1683_s2 = inlined_call_operand.vmem [shape: f32[32,32], index: 2, kind: input, shape index: {}]   ;;  %s1684_s3 = inlined_call_operand.vmem [shape: f32[32,32], index: 3, kind: input, shape index: {}]   ;;  %s1685_s4 = inlined_call_operand.vmem [shape: f32[32,1], index: 4, kind: input, shape index: {}]   ;;  %s1686_s5 = inlined_call_operand.vmem [shape: f32[64,64], index: 5, kind: input, shape index: {}]   ;;  %s1687_s6 = inlined_call_operand.vmem [shape: f32[3,8,64], index: 6, kind: output, shape index: {}]  }
   0x1 LB: > { %s948_s22 = sadd.s32 4294967295, %s1089_s21   ;;  %p952_p0 = scmp.ge.s32.totalorder %s1089_s21, 1  ;;  %s1089_s21 = sphi %s1132_s21, %s16_s21  }
   0x2   : > { %p211_p1 = scmp.lt.s32.totalorder %s1089_s21, 4 }
   0x4   : > { %p212_p2 = pnand %p952_p0, %p211_p1 }
   0x6   : > { %215 = sbr.rel (%p212_p2) target bundleno = 800 (0x320), region = 44 }
   0xb   : > { %p239_p3 = scmp.lt.s32.totalorder %s948_s22, 2  ;;  %v1143_v0 = vld [vmem:[%s1681_s0] sm:$0xff]  ;;  %v249_v2 = vld [vmem:[%s1683_s2 + $0x8] sm:$0xff]  ;;  %v250_v3 = vld [vmem:[%s1683_s2 + $0x10] sm:$0xff]  ;;  %s1293_s9 = smov 0  }
   0xc   : > { %v248_v1 = vld [vmem:[%s1683_s2] sm:$0xff]  ;;  %v251_v4 = vld [vmem:[%s1683_s2 + $0x18] sm:$0xff]  ;;  %v1694_v6 = vrot.slane %v1143_v0, 1  ;;  %v1693_v7 = vrot.slane %v1143_v0, 2  ;;  %v1692_v8 = vrot.slane %v1143_v0, 3  ;;  %v1168_v9 = vld [vmem:[%s1684_s3 + $0x8] sm:$0xff] }
   0xd   : > { %v1160_v5 = vld [vmem:[%s1684_s3] sm:$0xff]  ;;  %s1786_s22 = smov (!%p239_p3, %s948_s22), 2  ;;  %1704 = vst [vmem:[#allocation4_spill] sm:$0xff] %v1168_v9  ;;  %v1173_v10 = vld [vmem:[%s1684_s3 + $0x10] sm:$0xff]  ;;  %v1178_v11 = vld [vmem:[%s1684_s3 + $0x18] sm:$0xff]  ;;  %v1691_v12 = vrot.slane %v1143_v0, 4 }
   0xe   : > { %1703 = vst [vmem:[#allocation3_spill] sm:$0xff] %v1160_v5  ;;  %v1690_v13 = vrot.slane %v1143_v0, 5  ;;  %v1185_v14 = vld [vmem:[%s1685_s4] sm:$0xff]  ;;  %v1190_v15 = vld [vmem:[%s1685_s4 + $0x8] sm:$0xff]  ;;  %v1195_v16 = vld [vmem:[%s1685_s4 + $0x10] sm:$0xff]  ;;  %v1689_v17 = vrot.slane %v1143_v0, 6 }
   0xf   : > { %1705 = vst [vmem:[#allocation5_spill] sm:$0xff] %v1173_v10  ;;  %v1688_v18 = vrot.slane %v1143_v0, 7  ;;  %v268_v19 = vperm.slane %v1143_v0, 0  ;;  %s953_s25 = sshll.u32 %s1786_s22, 3  ;;  %v1203_v20 = vld [vmem:[%s1685_s4 + $0x18] sm:$0xff]  ;;  %v269_v21 = vperm.slane %v1694_v6, 0 }
  0x10   : > { %1706 = vst [vmem:[#allocation6_spill] sm:$0xff] %v1178_v11  ;;  %v270_v22 = vperm.slane %v1693_v7, 0  ;;  %v271_v23 = vperm.slane %v1692_v8, 0  ;;  %v272_v24 = vperm.slane %v1691_v12, 0  ;;  %s1216_s22 = scalar_lea.vmem %s1682_s1, %s953_s25  ;;  %s1221_s8 = scalar_lea.vmem %s1687_s6, %s953_s25  ;;  %v273_v25 = vperm.slane %v1690_v13, 0 }
  0x11   : > { %1707 = vst [vmem:[#allocation7_spill] sm:$0xff] %v1185_v14  ;;  %v274_v26 = vperm.slane %v1689_v17, 0  ;;  %v275_v27 = vperm.slane %v1688_v18, 0  ;;  %v1229_v28 = vmul.f32 %v268_v19, %v248_v1  ;;  %v1231_v29 = vmul.f32 %v268_v19, %v249_v2 }
  0x12   : > { %1708 = vst [vmem:[#allocation8_spill] sm:$0xff] %v1190_v15  ;;  %v1233_v30 = vmul.f32 %v268_v19, %v250_v3  ;;  %v1235_v31 = vmul.f32 %v268_v19, %v251_v4  ;;  %v1237_v32 = vmul.f32 %v269_v21, %v248_v1  ;;  %v1239_v33 = vmul.f32 %v269_v21, %v249_v2 }
  0x13   : > { %1709 = vst [vmem:[#allocation9_spill] sm:$0xff] %v1195_v16  ;;  %v1241_v34 = vmul.f32 %v269_v21, %v250_v3  ;;  %v1243_v35 = vmul.f32 %v269_v21, %v251_v4  ;;  %v1245_v36 = vmul.f32 %v270_v22, %v248_v1  ;;  %v1247_v37 = vmul.f32 %v270_v22, %v249_v2 }
  0x14   : > { %1710 = vst [vmem:[#allocation10_spill] sm:$0xff] %v1203_v20  ;;  %v1249_v38 = vmul.f32 %v270_v22, %v250_v3  ;;  %v1251_v39 = vmul.f32 %v270_v22, %v251_v4  ;;  %v1253_v40 = vmul.f32 %v271_v23, %v248_v1  ;;  %v1255_v41 = vmul.f32 %v271_v23, %v249_v2 }
  0x15   : > { %1711 = vst [vmem:[#allocation11_spill] sm:$0xff] %v1229_v28  ;;  %v1257_v42 = vmul.f32 %v271_v23, %v250_v3  ;;  %v1259_v43 = vmul.f32 %v271_v23, %v251_v4  ;;  %v1261_v44 = vmul.f32 %v272_v24, %v248_v1  ;;  %v1263_v45 = vmul.f32 %v272_v24, %v249_v2 }
  0x16   : > { %1712 = vst [vmem:[#allocation12_spill] sm:$0xff] %v1231_v29  ;;  %v1265_v46 = vmul.f32 %v272_v24, %v250_v3  ;;  %v1267_v47 = vmul.f32 %v272_v24, %v251_v4  ;;  %v1269_v48 = vmul.f32 %v273_v25, %v248_v1  ;;  %v1271_v49 = vmul.f32 %v273_v25, %v249_v2 }
  0x17   : > { %1713 = vst [vmem:[#allocation13_spill] sm:$0xff] %v1233_v30  ;;  %v1273_v50 = vmul.f32 %v273_v25, %v250_v3  ;;  %v1275_v51 = vmul.f32 %v273_v25, %v251_v4  ;;  %v1277_v52 = vmul.f32 %v274_v26, %v248_v1  ;;  %v1279_v53 = vmul.f32 %v274_v26, %v249_v2 }
  0x18   : > { %1714 = vst [vmem:[#allocation14_spill] sm:$0xff] %v1235_v31  ;;  %v1281_v54 = vmul.f32 %v274_v26, %v250_v3  ;;  %v1283_v55 = vmul.f32 %v274_v26, %v251_v4  ;;  %v1285_v56 = vmul.f32 %v275_v27, %v248_v1  ;;  %v1287_v57 = vmul.f32 %v275_v27, %v249_v2 }
  0x19   : > { %1715 = vst [vmem:[#allocation15_spill] sm:$0xff] %v1237_v32  ;;  %v1289_v58 = vmul.f32 %v275_v27, %v250_v3  ;;  %v1291_v59 = vmul.f32 %v275_v27, %v251_v4 }
  0x1a   : > { %1716 = vst [vmem:[#allocation16_spill] sm:$0xff] %v1239_v33 }
  0x1b   : > { %1717 = vst [vmem:[#allocation17_spill] sm:$0xff] %v1241_v34 }
  0x1c   : > { %1718 = vst [vmem:[#allocation18_spill] sm:$0xff] %v1243_v35 }
  0x1d   : > { %1719 = vst [vmem:[#allocation19_spill] sm:$0xff] %v1245_v36 }
  0x1e   : > { %1720 = vst [vmem:[#allocation20_spill] sm:$0xff] %v1247_v37 }
  0x1f   : > { %1721 = vst [vmem:[#allocation21_spill] sm:$0xff] %v1249_v38 }
  0x20   : > { %1722 = vst [vmem:[#allocation22_spill] sm:$0xff] %v1251_v39 }
  0x21   : > { %1723 = vst [vmem:[#allocation23_spill] sm:$0xff] %v1253_v40 }
  0x22   : > { %1724 = vst [vmem:[#allocation24_spill] sm:$0xff] %v1255_v41 }
  0x23   : > { %1725 = vst [vmem:[#allocation25_spill] sm:$0xff] %v1257_v42 }
  0x24   : > { %1726 = vst [vmem:[#allocation26_spill] sm:$0xff] %v1259_v43 }
  0x25   : > { %1727 = vst [vmem:[#allocation27_spill] sm:$0xff] %v1261_v44 }
  0x26   : > { %1728 = vst [vmem:[#allocation28_spill] sm:$0xff] %v1263_v45 }
  0x27   : > { %1729 = vst [vmem:[#allocation29_spill] sm:$0xff] %v1265_v46 }
  0x28 LB: >> { %v1095_v60 = vmov 0   ;;  %v1730_v16 = vld [vmem:[#allocation9_spill] sm:$0xff]  ;;  %v1731_v14 = vld [vmem:[#allocation7_spill] sm:$0xff]  ;;  %s322_s10 = scalar_lea.vmem %s1216_s22, %s1093_s9  ;;  %v1732_v20 = vld [vmem:[#allocation10_spill] sm:$0xff]  ;;  %vm1695_vm0 = vcmask 261120   ;;  %vm1702_vm1 = vcmask 1041409   ;;  %s1093_s9 = sphi %s1293_s9, %s321_s9  }
  0x29   : >> { %977 = vset.pattern.permute.xlu1 %v1095_v60  ;;  %976 = vset.pattern.permute.xlu0 %v1095_v60  ;;  %v1733_v15 = vld [vmem:[#allocation8_spill] sm:$0xff]  ;;  %v978_v61 = vld [vmem:[%s322_s10] ss:$0 sm:$0xff]  ;;  %v1734_v5 = vld [vmem:[#allocation3_spill] sm:$0xff]  ;;  %vm1701_vm2 = vcmask 1042434   ;;  %vm1700_vm3 = vcmask 1043459  }
  0x2a   : >> { %405 = vperm.xlu1 %977, %v1730_v16   ;;  %395 = vperm.xlu0 %976, %v1731_v14   ;;  %v1305_v62 = vmul.f32 %v978_v61, %v1734_v5  ;;  %v1735_v10 = vld [vmem:[#allocation5_spill] sm:$0xff]  ;;  %v1736_v28 = vld [vmem:[#allocation11_spill] sm:$0xff]  ;;  %v1745_v11 = vld [vmem:[#allocation6_spill] sm:$0xff]  ;;  %vm1699_vm4 = vcmask 1044484   ;;  %vm1698_vm5 = vcmask 1045509   ;;  %vm1697_vm6 = vcmask 1046534  }
  0x2b   : >> { %v1308_v63 = vmul.f32 %v978_v61, %v1735_v10  ;;  %v1737_v32 = vld [vmem:[#allocation15_spill] sm:$0xff]  ;;  %v1739_v30 = vld [vmem:[#allocation13_spill] sm:$0xff]  ;;  %v1331_v26 = vmul.f32 %v978_v61, %v1745_v11  ;;  %v1747_v31 = vld [vmem:[#allocation14_spill] sm:$0xff]  ;;  %vm1696_vm7 = vcmask 1047559   ;;  %s824_s11 = scalar_lea.vmem [#allocation2], %s1093_s9  ;;  %s321_s9 = sadd.s32 1, %s1093_s9  }
  0x2c   : >> { %v329_v1 = vadd.f32 %v1305_v62, %v1736_v28  ;;  %v333_v2 = vadd.f32 %v1305_v62, %v1737_v32  ;;  %v1738_v36 = vld [vmem:[#allocation19_spill] sm:$0xff]  ;;  %v1740_v34 = vld [vmem:[#allocation17_spill] sm:$0xff]  ;;  %v1748_v35 = vld [vmem:[#allocation18_spill] sm:$0xff]  ;;  %p318_p4 = scmp.ge.s32.totalorder %s321_s9, 8  }
  0x2d   : >> { %v337_v3 = vadd.f32 %v1305_v62, %v1738_v36  ;;  %v331_v4 = vadd.f32 %v1308_v63, %v1739_v30  ;;  %v335_v19 = vadd.f32 %v1308_v63, %v1740_v34  ;;  %v1741_v38 = vld [vmem:[#allocation21_spill] sm:$0xff]  ;;  %v351_v24 = vadd.f32 %v1308_v63, %v1273_v50  ;;  %v1744_v40 = vld [vmem:[#allocation23_spill] sm:$0xff]  ;;  %v1749_v39 = vld [vmem:[#allocation22_spill] sm:$0xff]  ;;  %s1096_s16 = smov (%p318_p4), 32  }
  0x2e   : >> { %979 = vtanh.f32 %v329_v1  ;;  %v339_v21 = vadd.f32 %v1308_v63, %v1741_v38  ;;  %v1742_v42 = vld [vmem:[#allocation25_spill] sm:$0xff]  ;;  %v341_v25 = vadd.f32 %v1305_v62, %v1744_v40  ;;  %v1746_v44 = vld [vmem:[#allocation27_spill] sm:$0xff]  ;;  %v1750_v43 = vld [vmem:[#allocation26_spill] sm:$0xff] }
  0x2f   : >> { %981 = vtanh.f32 %v333_v2  ;;  %v343_v22 = vadd.f32 %v1308_v63, %v1742_v42  ;;  %v1743_v46 = vld [vmem:[#allocation29_spill] sm:$0xff]  ;;  %v345_v60 = vadd.f32 %v1305_v62, %v1746_v44  ;;  %v349_v2 = vadd.f32 %v1305_v62, %v1269_v48  ;;  %v1751_v9 = vld [vmem:[#allocation4_spill] sm:$0xff]  ;;  %v835_v50 = vld [vmem:[%s1686_s5] sm:$0xff] (%p318_p4) }
  0x30   : >> { %983 = vtanh.f32 %v337_v3  ;;  %v347_v23 = vadd.f32 %v1308_v63, %v1743_v46  ;;  %v326_v13 = vmul.f32 %v978_v61, %v1751_v9  ;;  %v1752_v29 = vld [vmem:[#allocation12_spill] sm:$0xff] }
  0x31   : >> { %985 = vtanh.f32 %v331_v4  ;;  %v353_v4 = vadd.f32 %v1305_v62, %v1277_v52  ;;  %v1753_v33 = vld [vmem:[#allocation16_spill] sm:$0xff] }
  0x32   : >> { %410 = vperm.xlu1 %977, %v1732_v20   ;;  %400 = vperm.xlu0 %976, %v1733_v15   ;;  %987 = vtanh.f32 %v335_v19  ;;  %v330_v61 = vadd.f32 %v326_v13, %v1752_v29  ;;  %v334_v9 = vadd.f32 %v326_v13, %v1753_v33  ;;  %v1754_v37 = vld [vmem:[#allocation20_spill] sm:$0xff]  ;;  %v358_v29 = vadd.f32 %v326_v13, %v1287_v57 }
  0x33   : >> { %989 = vtanh.f32 %v339_v21  ;;  %v332_v21 = vadd.f32 %v1331_v26, %v1747_v31  ;;  %v338_v10 = vadd.f32 %v326_v13, %v1754_v37  ;;  %v1755_v41 = vld [vmem:[#allocation24_spill] sm:$0xff] }
  0x34   : >> { %v1333_v27 = vpop.eup %979  ;;  %991 = vtanh.f32 %v343_v22  ;;  %v1756_v45 = vld [vmem:[#allocation28_spill] sm:$0xff] }
  0x35   : >> { %v1337_v1 = vpop.eup %981  ;;  %993 = vtanh.f32 %v347_v23  ;;  %v336_v23 = vadd.f32 %v1331_v26, %v1748_v35  ;;  %v837_v48 = vld [vmem:[%s1686_s5 + $0x10] sm:$0xff] (%p318_p4) }
  0x36   : >> { %v1341_v3 = vpop.eup %983  ;;  %995 = vtanh.f32 %v351_v24  ;;  %v340_v24 = vadd.f32 %v1331_v26, %v1749_v39 }
  0x37   : >> { %v1345_v19 = vpop.eup %985  ;;  %997 = vtanh.f32 %v341_v25  ;;  %v344_v25 = vadd.f32 %v1331_v26, %v1750_v43 }
  0x38   : >> { %v1349_v22 = vpop.eup %987  ;;  %999 = vtanh.f32 %v345_v60  ;;  %v348_v60 = vadd.f32 %v1331_v26, %v1267_v47  ;;  %v838_v47 = vld [vmem:[%s1686_s5 + $0x18] sm:$0xff] (%p318_p4) }
  0x39   : >> { %v1353_v18 = vpop.eup %989  ;;  %1001 = vtanh.f32 %v349_v2  ;;  %v352_v2 = vadd.f32 %v1331_v26, %v1275_v51  ;;  %v827_v51 = vld [vmem:[%s1216_s22] sm:$0xff] (%p318_p4) }
  0x3a   : >> { %v992_v17 = vpop.eup %991  ;;  %1003 = vtanh.f32 %v353_v4  ;;  %v356_v4 = vadd.f32 %v1331_v26, %v1283_v55 }
  0x3b   : >> { %v1360_v12 = vpop.eup %993  ;;  %1005 = vtanh.f32 %v332_v21 }
  0x3c   : >> { %v1364_v8 = vpop.eup %995  ;;  %1007 = vtanh.f32 %v336_v23  ;;  %v342_v23 = vadd.f32 %v326_v13, %v1755_v41 }
  0x3d   : >> { %v998_v7 = vpop.eup %997  ;;  %1009 = vtanh.f32 %v340_v24  ;;  %v346_v24 = vadd.f32 %v326_v13, %v1756_v45 }
  0x3e   : >> { %v1000_v6 = vpop.eup %999  ;;  %1011 = vtanh.f32 %v344_v25 }
  0x3f   : >> { %v1002_v5 = vpop.eup %1001  ;;  %1013 = vtanh.f32 %v348_v60  ;;  %v350_v60 = vadd.f32 %v326_v13, %v1271_v49  ;;  %v836_v49 = vld [vmem:[%s1686_s5 + $0x8] sm:$0xff] (%p318_p4) }
  0x40   : >> { %v1004_v21 = vpop.eup %1003  ;;  %1015 = vtanh.f32 %v352_v2  ;;  %v355_v2 = vadd.f32 %v1308_v63, %v1281_v54 }
  0x41   : >> { %v1373_v11 = vpop.eup %1005  ;;  %1017 = vtanh.f32 %v356_v4  ;;  %v357_v4 = vadd.f32 %v1305_v62, %v1285_v56 }
  0x42   : >> { %v1376_v14 = vpop.eup %1007  ;;  %1019 = vtanh.f32 %v330_v61  ;;  %v359_v61 = vadd.f32 %v1308_v63, %v1289_v58  ;;  %v360_v63 = vadd.f32 %v1331_v26, %v1291_v59 }
  0x43   : >> { %v1379_v25 = vpop.eup %1009  ;;  %1021 = vtanh.f32 %v334_v9  ;;  %v354_v9 = vadd.f32 %v326_v13, %v1279_v53 }
  0x44   : >> { %v1382_v15 = vpop.eup %1011  ;;  %1023 = vtanh.f32 %v338_v10 }
  0x45   : >> { %v1386_v16 = vpop.eup %1013  ;;  %1025 = vtanh.f32 %v342_v23 }
  0x46   : >> { %v1390_v20 = vpop.eup %1015  ;;  %1027 = vtanh.f32 %v346_v24 }
  0x47   : >> { %v1394_v28 = vpop.eup %1017  ;;  %1029 = vtanh.f32 %v350_v60 }
  0x48   : >> { %v1020_v10 = vpop.eup %1019  ;;  %1031 = vtanh.f32 %v355_v2 }
  0x49   : >> { %v1398_v30 = vpop.eup %1021  ;;  %1033 = vtanh.f32 %v357_v4 }
  0x4a   : >> { %v1400_v23 = vpop.eup %1023  ;;  %1035 = vtanh.f32 %v359_v61 }
  0x4b   : >> { %v1026_v62 = vpop.eup %1025  ;;  %1037 = vtanh.f32 %v354_v9 }
  0x4c   : >> { %v1028_v32 = vpop.eup %1027  ;;  %1039 = vtanh.f32 %v358_v29 }
  0x4d   : >> { %v1030_v13 = vpop.eup %1029  ;;  %1041 = vtanh.f32 %v360_v63 }
  0x4e   : >> { %v1032_v35 = vpop.eup %1031 }
  0x4f   : >> { %v1034_v38 = vpop.eup %1033 }
  0x50   : >> { %v1036_v39 = vpop.eup %1035 }
  0x9c   : >> { %v406_v24 = vpop.permute.xlu1 %405  ;;  %v396_v31 = vpop.permute.xlu0 %395 }
  0x9d   : >> { %v415_v60 = vmul.f32 %v1345_v19, %v406_v24  ;;  %v419_v33 = vmul.f32 %v1349_v22, %v406_v24  ;;  %v423_v2 = vmul.f32 %v1353_v18, %v406_v24  ;;  %v427_v4 = vmul.f32 %v992_v17, %v406_v24 }
  0x9e   : >> { %v413_v61 = vmul.f32 %v1333_v27, %v396_v31  ;;  %v417_v34 = vmul.f32 %v1337_v1, %v396_v31  ;;  %v421_v9 = vmul.f32 %v1341_v3, %v396_v31  ;;  %v425_v36 = vmul.f32 %v998_v7, %v396_v31  ;;  %v1038_v3 = vpop.eup %1037 }
  0x9f   : >> { %v429_v26 = vmul.f32 %v1000_v6, %v396_v31  ;;  %v433_v37 = vmul.f32 %v1002_v5, %v396_v31  ;;  %v431_v19 = vmul.f32 %v1360_v12, %v406_v24  ;;  %v435_v22 = vmul.f32 %v1364_v8, %v406_v24  ;;  %v1040_v8 = vpop.eup %1039 }
  0xa0   : >> { %v437_v29 = vmul.f32 %v1004_v21, %v396_v31  ;;  %v446_v17 = vsel %vm1695_vm0, %v413_v61, 0.0  ;;  %v449_v18 = vsel %vm1695_vm0, %v415_v60, 0.0  ;;  %v459_v27 = vsel %vm1695_vm0, %v417_v34, 0.0 }
  0xa1   : >> { %v462_v1 = vsel %vm1695_vm0, %v419_v33, 0.0  ;;  %v472_v6 = vsel %vm1695_vm0, %v421_v9, 0.0  ;;  %v475_v5 = vsel %vm1695_vm0, %v423_v2, 0.0  ;;  %v485_v7 = vsel %vm1695_vm0, %v425_v36, 0.0 }
  0xa2   : >> { %v439_v12 = vmul.f32 %v1032_v35, %v406_v24  ;;  %v488_v21 = vsel %vm1695_vm0, %v427_v4, 0.0  ;;  %v498_v63 = vsel %vm1695_vm0, %v429_v26, 0.0  ;;  %v511_v61 = vsel %vm1695_vm0, %v433_v37, 0.0 }
  0xa3   : >> { %v1422_v60 = vmul.f32 %v1034_v38, %v396_v31  ;;  %v1426_v40 = vmul.f32 %v1036_v39, %v406_v24  ;;  %v501_v9 = vsel %vm1695_vm0, %v431_v19, 0.0  ;;  %v514_v2 = vsel %vm1695_vm0, %v435_v22, 0.0  ;;  %v1439_v38 = vpop.eup %1041 }
  0xa4   : >> { %v1424_v34 = vpop.permute.xlu1 %410  ;;  %v401_v33 = vpop.permute.xlu0 %400  ;;  %v524_v35 = vsel %vm1695_vm0, %v437_v29, 0.0 }
  0xa5   : >> { %v416_v36 = vmul.f32 %v1373_v11, %v1424_v34  ;;  %v420_v4 = vmul.f32 %v1376_v14, %v1424_v34  ;;  %v424_v31 = vmul.f32 %v1379_v25, %v1424_v34  ;;  %v428_v37 = vmul.f32 %v1382_v15, %v1424_v34 }
  0xa6   : >> { %v432_v39 = vmul.f32 %v1386_v16, %v1424_v34  ;;  %v436_v24 = vmul.f32 %v1390_v20, %v1424_v34  ;;  %v414_v26 = vmul.f32 %v1020_v10, %v401_v33  ;;  %v527_v11 = vsel %vm1695_vm0, %v439_v12, 0.0 }
  0xa7   : >> { %v440_v14 = vmul.f32 %v1394_v28, %v1424_v34  ;;  %v451_v19 = vsel %vm1695_vm0, %v416_v36, 0.0  ;;  %v464_v25 = vsel %vm1695_vm0, %v420_v4, 0.0  ;;  %v477_v15 = vsel %vm1695_vm0, %v424_v31, 0.0 }
  0xa8   : >> { %v490_v22 = vsel %vm1695_vm0, %v428_v37, 0.0  ;;  %v418_v29 = vmul.f32 %v1398_v30, %v401_v33  ;;  %v422_v16 = vmul.f32 %v1400_v23, %v401_v33  ;;  %v426_v41 = vmul.f32 %v1026_v62, %v401_v33 }
  0xa9   : >> { %v503_v20 = vsel %vm1695_vm0, %v432_v39, 0.0  ;;  %v430_v10 = vmul.f32 %v1028_v32, %v401_v33  ;;  %v434_v12 = vmul.f32 %v1030_v13, %v401_v33  ;;  %v438_v42 = vmul.f32 %v1038_v3, %v401_v33 }
  0xaa   : >> { %v447_v28 = vsel %vm1695_vm0, %v414_v26, 0.0  ;;  %v460_v36 = vsel %vm1695_vm0, %v418_v29, 0.0  ;;  %v473_v4 = vsel %vm1695_vm0, %v422_v16, 0.0  ;;  %v486_v31 = vsel %vm1695_vm0, %v426_v41, 0.0 }
  0xab   : >> { %v448_v43 = vadd.f32 %v447_v28, %v446_v17  ;;  %v461_v37 = vadd.f32 %v460_v36, %v459_v27  ;;  %v474_v44 = vadd.f32 %v473_v4, %v472_v6  ;;  %v487_v30 = vadd.f32 %v486_v31, %v485_v7 }
  0xac   : >> { %v442_v45 = vmul.f32 %v1040_v8, %v401_v33  ;;  %v499_v23 = vsel %vm1695_vm0, %v430_v10, 0.0  ;;  %v512_v62 = vsel %vm1695_vm0, %v434_v12, 0.0  ;;  %v525_v32 = vsel %vm1695_vm0, %v438_v42, 0.0 }
  0xad   : >> { %v450_v13 = vadd.f32 %v449_v18, %v448_v43  ;;  %v463_v3 = vadd.f32 %v462_v1, %v461_v37  ;;  %v476_v39 = vadd.f32 %v475_v5, %v474_v44  ;;  %v489_v26 = vadd.f32 %v488_v21, %v487_v30 }
  0xae   : >> { %v500_v29 = vadd.f32 %v499_v23, %v498_v63  ;;  %v513_v46 = vadd.f32 %v512_v62, %v511_v61  ;;  %v516_v16 = vsel %vm1695_vm0, %v436_v24, 0.0  ;;  %v526_v41 = vadd.f32 %v525_v32, %v524_v35 }
  0xaf   : >> { %v452_v17 = vadd.f32 %v451_v19, %v450_v13  ;;  %v465_v27 = vadd.f32 %v464_v25, %v463_v3  ;;  %v478_v6 = vadd.f32 %v477_v15, %v476_v39  ;;  %v491_v7 = vadd.f32 %v490_v22, %v489_v26 }
  0xb0   : >> { %v502_v8 = vadd.f32 %v501_v9, %v500_v29  ;;  %v515_v33 = vadd.f32 %v514_v2, %v513_v46  ;;  %v528_v10 = vadd.f32 %v527_v11, %v526_v41  ;;  %v529_v12 = vsel %vm1695_vm0, %v440_v14, 0.0 }
  0xb1   : >> { %v453_v28 = vrot.slane %v452_v17, 4  ;;  %v466_v42 = vrot.slane %v465_v27, 4  ;;  %v479_v43 = vrot.slane %v478_v6, 4  ;;  %v492_v18 = vrot.slane %v491_v7, 4 }
  0xb2   : >> { %v504_v44 = vadd.f32 %v503_v20, %v502_v8  ;;  %v517_v1 = vadd.f32 %v516_v16, %v515_v33  ;;  %v530_v5 = vadd.f32 %v529_v12, %v528_v10  ;;  %v537_v21 = vsel %vm1695_vm0, %v1422_v60, 0.0 }
  0xb3   : >> { %v454_v63 = vadd.f32 %v453_v28, %v452_v17  ;;  %v467_v61 = vadd.f32 %v466_v42, %v465_v27  ;;  %v480_v35 = vadd.f32 %v479_v43, %v478_v6  ;;  %v493_v24 = vadd.f32 %v492_v18, %v491_v7 }
  0xb4   : >> { %v505_v19 = vrot.slane %v504_v44, 4  ;;  %v518_v9 = vrot.slane %v517_v1, 4  ;;  %v531_v46 = vrot.slane %v530_v5, 4  ;;  %v538_v2 = vsel %vm1695_vm0, %v442_v45, 0.0 }
  0xb5   : >> { %v455_v11 = vrot.slane %v454_v63, 2  ;;  %v468_v14 = vrot.slane %v467_v61, 2  ;;  %v481_v25 = vrot.slane %v480_v35, 2  ;;  %v494_v15 = vrot.slane %v493_v24, 2 }
  0xb6   : >> { %v506_v22 = vadd.f32 %v505_v19, %v504_v44  ;;  %v519_v20 = vadd.f32 %v518_v9, %v517_v1  ;;  %v532_v36 = vadd.f32 %v531_v46, %v530_v5  ;;  %v539_v4 = vadd.f32 %v538_v2, %v537_v21 }
  0xb7   : >> { %v456_v31 = vadd.f32 %v455_v11, %v454_v63  ;;  %v469_v37 = vadd.f32 %v468_v14, %v467_v61  ;;  %v482_v60 = vadd.f32 %v481_v25, %v480_v35  ;;  %v495_v30 = vadd.f32 %v494_v15, %v493_v24 }
  0xb8   : >> { %v444_v23 = vmul.f32 %v1439_v38, %v1424_v34  ;;  %v507_v62 = vrot.slane %v506_v22, 2  ;;  %v520_v32 = vrot.slane %v519_v20, 2  ;;  %v540_v39 = vsel %vm1695_vm0, %v1426_v40, 0.0 }
  0xb9   : >> { %v457_v13 = vrot.slane %v456_v31, 1  ;;  %v470_v3 = vrot.slane %v469_v37, 1  ;;  %v483_v45 = vrot.slane %v482_v60, 1  ;;  %v496_v26 = vrot.slane %v495_v30, 1 }
  0xba   : >> { %v508_v29 = vadd.f32 %v507_v62, %v506_v22  ;;  %v533_v16 = vrot.slane %v532_v36, 2  ;;  %v541_v41 = vadd.f32 %v540_v39, %v539_v4  ;;  %v521_v7 = vadd.f32 %v520_v32, %v519_v20 }
  0xbb   : >> { %v458_v17 = vadd.f32 %v457_v13, %v456_v31  ;;  %v471_v27 = vadd.f32 %v470_v3, %v469_v37  ;;  %v484_v6 = vadd.f32 %v483_v45, %v482_v60  ;;  %v542_v33 = vsel %vm1695_vm0, %v444_v23, 0.0 }
  0xbc   : >> { %v509_v8 = vrot.slane %v508_v29, 1  ;;  %v543_v34 = vadd.f32 %v542_v33, %v541_v41  ;;  %v497_v38 = vadd.f32 %v496_v26, %v495_v30  ;;  %v534_v10 = vadd.f32 %v533_v16, %v532_v36 }
  0xbd   : >> { %v559_v12 = vsel %vm1702_vm1, %v471_v27, %v458_v17  ;;  %v522_v40 = vrot.slane %v521_v7, 1 }
  0xbe   : >> { %v544_v28 = vrot.slane %v543_v34, 4  ;;  %v561_v42 = vsel %vm1701_vm2, %v484_v6, %v559_v12  ;;  %v510_v43 = vadd.f32 %v509_v8, %v508_v29  ;;  %v535_v1 = vrot.slane %v534_v10, 1 }
  0xbf   : >> { %v563_v18 = vsel %vm1700_vm3, %v497_v38, %v561_v42  ;;  %v523_v21 = vadd.f32 %v522_v40, %v521_v7 }
  0xc0   : >> { %v545_v44 = vadd.f32 %v544_v28, %v543_v34  ;;  %v565_v5 = vsel %vm1699_vm4, %v510_v43, %v563_v18  ;;  %v536_v24 = vadd.f32 %v535_v1, %v534_v10 }
  0xc1   : >> { %v567_v35 = vsel %vm1698_vm5, %v523_v21, %v565_v5 }
  0xc2   : >> { %v546_v63 = vrot.slane %v545_v44, 2  ;;  %v569_v9 = vsel %vm1697_vm6, %v536_v24, %v567_v35 }
  0xc4   : >> { %v547_v61 = vadd.f32 %v546_v63, %v545_v44 }
  0xc6   : >> { %v548_v19 = vrot.slane %v547_v61, 1 }
  0xc8   : >> { %v549_v46 = vadd.f32 %v548_v19, %v547_v61 }
  0xca   : >> { %v571_v2 = vsel %vm1696_vm7, %v549_v46, %v569_v9 }
  0xcb   : >> { %v573_v11 = vsel %vm1695_vm0, %v571_v2, -inf }
  0xcc   : >> { %574 = vmax.xlane.f32.xlu2 %v573_v11 }
 0x13f   : >> { %v575_v14 = vpop.xlane.xlu2 %574 }
 0x140   : >> { %v577_v25 = vrot.slane %v575_v14, 1  ;;  %v578_v15 = vrot.slane %v575_v14, 2  ;;  %v579_v22 = vrot.slane %v575_v14, 3  ;;  %v580_v20 = vrot.slane %v575_v14, 4 }
 0x141   : >> { %v581_v36 = vrot.slane %v575_v14, 5  ;;  %v592_v4 = vsub.f32 %v458_v17, %v575_v14  ;;  %v582_v31 = vrot.slane %v575_v14, 6  ;;  %v583_v37 = vrot.slane %v575_v14, 7 }
 0x142   : >> { %v593_v60 = vsub.f32 %v471_v27, %v577_v25  ;;  %v594_v30 = vsub.f32 %v484_v6, %v578_v15  ;;  %v595_v23 = vsub.f32 %v497_v38, %v579_v22  ;;  %v596_v62 = vsub.f32 %v510_v43, %v580_v20 }
 0x143   : >> { %v600_v32 = vmul.f32 1.442695, %v592_v4  ;;  %v597_v13 = vsub.f32 %v523_v21, %v581_v36  ;;  %v598_v3 = vsub.f32 %v536_v24, %v582_v31  ;;  %v599_v29 = vsub.f32 %v549_v46, %v583_v37 }
 0x144   : >> { %v602_v45 = vmul.f32 1.442695, %v593_v60  ;;  %v604_v39 = vmul.f32 1.442695, %v594_v30  ;;  %v606_v26 = vmul.f32 1.442695, %v595_v23 }
 0x145   : >> { %1043 = vpow2.f32 %v600_v32  ;;  %v608_v16 = vmul.f32 1.442695, %v596_v62  ;;  %v610_v41 = vmul.f32 1.442695, %v597_v13  ;;  %v612_v7 = vmul.f32 1.442695, %v598_v3 }
 0x146   : >> { %1045 = vpow2.f32 %v602_v45  ;;  %v614_v17 = vmul.f32 1.442695, %v599_v29 }
 0x147   : >> { %1047 = vpow2.f32 %v604_v39 }
 0x148   : >> { %1049 = vpow2.f32 %v606_v26 }
 0x149   : >> { %1051 = vpow2.f32 %v608_v16 }
 0x14a   : >> { %1053 = vpow2.f32 %v610_v41 }
 0x14b   : >> { %v1480_v27 = vpop.eup %1043  ;;  %1055 = vpow2.f32 %v612_v7 }
 0x14c   : >> { %v1482_v6 = vpop.eup %1045  ;;  %1057 = vpow2.f32 %v614_v17 }
 0x14d   : >> { %v1484_v8 = vpop.eup %1047  ;;  %v624_v33 = vrot.slane %v1482_v6, 7 }
 0x14e   : >> { %v1487_v34 = vpop.eup %1049  ;;  %v626_v38 = vrot.slane %v1484_v8, 6 }
 0x14f   : >> { %v1490_v10 = vpop.eup %1051  ;;  %v625_v12 = vsel %vm1702_vm1, %v624_v33, %v1480_v27  ;;  %v628_v40 = vrot.slane %v1487_v34, 5 }
 0x150   : >> { %v1495_v28 = vpop.eup %1053  ;;  %v627_v42 = vsel %vm1701_vm2, %v626_v38, %v625_v12  ;;  %v630_v43 = vrot.slane %v1490_v10, 4 }
 0x151   : >> { %v1499_v18 = vpop.eup %1055  ;;  %v629_v44 = vsel %vm1700_vm3, %v628_v40, %v627_v42  ;;  %v632_v1 = vrot.slane %v1495_v28, 3 }
 0x152   : >> { %v1503_v5 = vpop.eup %1057  ;;  %v631_v21 = vsel %vm1699_vm4, %v630_v43, %v629_v44  ;;  %v634_v63 = vrot.slane %v1499_v18, 2 }
 0x153   : >> { %v633_v61 = vsel %vm1698_vm5, %v632_v1, %v631_v21  ;;  %v636_v35 = vrot.slane %v1503_v5, 1 }
 0x154   : >> { %v635_v24 = vsel %vm1697_vm6, %v634_v63, %v633_v61 }
 0x155   : >> { %v637_v19 = vsel %vm1696_vm7, %v636_v35, %v635_v24 }
 0x156   : >> { %v639_v9 = vsel %vm1695_vm0, %v637_v19, 0.0 }
 0x157   : >> { %640 = vadd.xlane.f32.xlu2 %v639_v9 }
 0x1ca   : >> { %v641_v46 = vpop.xlane.xlu2 %640 }
 0x1cb   : >> { %v1512_v2 = vrot.slane %v641_v46, 1  ;;  %v1514_v11 = vrot.slane %v641_v46, 2  ;;  %v1516_v14 = vrot.slane %v641_v46, 3  ;;  %1059 = vrcp.f32 %v641_v46 }
 0x1cc   : >> { %v1519_v25 = vrot.slane %v641_v46, 4  ;;  %v667_v15 = vand.u32 2147483647, %v641_v46  ;;  %v669_v22 = vand.u32 2147483648, %v641_v46  ;;  %v1524_v36 = vrot.slane %v641_v46, 5 }
 0x1cd   : >> { %1061 = vrcp.f32 %v1512_v2  ;;  %v684_v20 = vand.u32 2147483648, %v1512_v2  ;;  %v682_v4 = vand.u32 2147483647, %v1512_v2  ;;  %v697_v31 = vand.u32 2147483647, %v1514_v11 }
 0x1ce   : >> { %1063 = vrcp.f32 %v1514_v11  ;;  %v699_v37 = vand.u32 2147483648, %v1514_v11  ;;  %v1529_v30 = vrot.slane %v641_v46, 6  ;;  %v1531_v23 = vrot.slane %v641_v46, 7 }
 0x1cf   : >> { %1065 = vrcp.f32 %v1516_v14  ;;  %vm663_vm8 = vweird.f32 %v641_v46  ;;  %vm678_vm9 = vweird.f32 %v1512_v2  ;;  %v712_v13 = vand.u32 2147483647, %v1516_v14 }
 0x1d0   : >> { %1067 = vrcp.f32 %v1519_v25  ;;  %v714_v3 = vand.u32 2147483648, %v1516_v14  ;;  %vm1537_vm10 = vcmp.eq.f32.partialorder %v667_v15, 8.507059e+37  ;;  %v670_v26 = vor.u32 1.1754944e-38, %v669_v22 }
 0x1d1   : >> { %v1060_v60 = vpop.eup %1059  ;;  %v685_v16 = vor.u32 1.1754944e-38, %v684_v20  ;;  %vm693_vm11 = vweird.f32 %v1514_v11  ;;  %vm1543_vm12 = vcmp.eq.f32.partialorder %v682_v4, 8.507059e+37  ;;  %vm1548_vm13 = vcmp.eq.f32.partialorder %v697_v31, 8.507059e+37 }
 0x1d2   : >> { %v659_v32 = vmul.f32 %v1060_v60, %v641_v46  ;;  %v700_v38 = vor.u32 1.1754944e-38, %v699_v37  ;;  %vm708_vm14 = vweird.f32 %v1516_v14  ;;  %1069 = vrcp.f32 %v1524_v36 }
 0x1d3   : >> { %v1062_v62 = vpop.eup %1061  ;;  %vm664_vm15 = vweird.f32 %v1060_v60  ;;  %v727_v42 = vand.u32 2147483647, %v1519_v25  ;;  %v729_v43 = vand.u32 2147483648, %v1519_v25  ;;  %vm1557_vm0 = vcmp.eq.f32.partialorder %v712_v13, 8.507059e+37 }
 0x1d4   : >> { %v1064_v45 = vpop.eup %1063  ;;  %v674_v29 = vmul.f32 %v1062_v62, %v1512_v2  ;;  %v660_v41 = vsub.f32 1.0, %v659_v32  ;;  %v715_v61 = vor.u32 1.1754944e-38, %v714_v3  ;;  %vm679_vm7 = vweird.f32 %v1062_v62  ;;  %vm1566_vm4 = vmor %vm663_vm8, %vm664_vm15 }
 0x1d5   : >> { %v689_v17 = vmul.f32 %v1064_v45, %v1514_v11  ;;  %v1066_v12 = vpop.eup %1065  ;;  %vm694_vm6 = vweird.f32 %v1064_v45  ;;  %vm723_vm5 = vweird.f32 %v1519_v25  ;;  %1071 = vrcp.f32 %v1529_v30  ;;  %vm680_vm8 = vmor %vm678_vm9, %vm679_vm7 }
 0x1d6   : >> { %v675_v40 = vsub.f32 1.0, %v674_v29  ;;  %v661_v44 = vmul.f32 %v1060_v60, %v660_v41  ;;  %v704_v21 = vmul.f32 %v1066_v12, %v1516_v14  ;;  %v1068_v35 = vpop.eup %1067  ;;  %vm709_vm3 = vweird.f32 %v1066_v12  ;;  %vm695_vm15 = vmor %vm693_vm11, %vm694_vm6 }
 0x1d7   : >> { %v690_v1 = vsub.f32 1.0, %v689_v17  ;;  %v719_v22 = vmul.f32 %v1068_v35, %v1519_v25  ;;  %vm1570_vm2 = vcmp.eq.f32.partialorder %v727_v42, 8.507059e+37  ;;  %v730_v37 = vor.u32 1.1754944e-38, %v729_v43  ;;  %vm710_vm6 = vmor %vm708_vm14, %vm709_vm3 }
 0x1d8   : >> { %v676_v24 = vmul.f32 %v1062_v62, %v675_v40  ;;  %v662_v19 = vadd.f32 %v1060_v60, %v661_v44  ;;  %v705_v15 = vsub.f32 1.0, %v704_v21  ;;  %v744_v32 = vand.u32 2147483648, %v1524_v36  ;;  %v1070_v13 = vpop.eup %1069 }
 0x1d9   : >> { %v691_v9 = vmul.f32 %v1064_v45, %v690_v1  ;;  %v720_v41 = vsub.f32 1.0, %v719_v22  ;;  %v734_v40 = vmul.f32 %v1070_v13, %v1524_v36  ;;  %vm738_vm1 = vweird.f32 %v1524_v36 }
 0x1da   : >> { %v677_v4 = vadd.f32 %v1062_v62, %v676_v24  ;;  %v666_v3 = vsel %vm1566_vm4, %v1060_v60, %v662_v19  ;;  %v706_v29 = vmul.f32 %v1066_v12, %v705_v15  ;;  %v742_v42 = vand.u32 2147483647, %v1524_v36 }
 0x1db   : >> { %v692_v46 = vadd.f32 %v1064_v45, %v691_v9  ;;  %v671_v60 = vsel %vm1537_vm10, %v670_v26, %v666_v3  ;;  %vm724_vm4 = vweird.f32 %v1068_v35  ;;  %v1072_v44 = vpop.eup %1071  ;;  %v721_v1 = vmul.f32 %v1068_v35, %v720_v41 }
 0x1dc   : >> { %v681_v17 = vsel %vm680_vm8, %v1062_v62, %v677_v4  ;;  %v707_v2 = vadd.f32 %v1066_v12, %v706_v29  ;;  %v735_v21 = vsub.f32 1.0, %v734_v40  ;;  %vm739_vm7 = vweird.f32 %v1070_v13  ;;  %vm725_vm3 = vmor %vm723_vm5, %vm724_vm4 }
 0x1dd   : >> { %v696_v43 = vsel %vm695_vm15, %v1064_v45, %v692_v46  ;;  %v686_v62 = vsel %vm1543_vm12, %v685_v16, %v681_v17  ;;  %v745_v39 = vor.u32 1.1754944e-38, %v744_v32  ;;  %v749_v45 = vmul.f32 %v1072_v44, %v1529_v30 }
 0x1de   : >> { %v701_v11 = vsel %vm1548_vm13, %v700_v38, %v696_v43  ;;  %v711_v24 = vsel %vm710_vm6, %v1066_v12, %v707_v2  ;;  %v672_v26 = vmul.f32 %v1480_v27, %v671_v60  ;;  %v722_v16 = vadd.f32 %v1068_v35, %v721_v1 }
 0x1df   : >> { %v716_v7 = vsel %vm1557_vm0, %v715_v61, %v711_v24  ;;  %v736_v19 = vmul.f32 %v1070_v13, %v735_v21  ;;  %v687_v33 = vmul.f32 %v1482_v6, %v686_v62  ;;  %v702_v38 = vmul.f32 %v1484_v8, %v701_v11  ;;  %vm740_vm0 = vmor %vm738_vm1, %vm739_vm7 }
 0x1e0   : >> { %v750_v14 = vsub.f32 1.0, %v749_v45  ;;  %1073 = vrcp.f32 %v1531_v23  ;;  %v717_v12 = vmul.f32 %v1487_v34, %v716_v7  ;;  %v726_v9 = vsel %vm725_vm3, %v1068_v35, %v722_v16 }
 0x1e1   : >> { %v737_v27 = vadd.f32 %v1070_v13, %v736_v19  ;;  %v759_v63 = vand.u32 2147483648, %v1529_v30  ;;  %v731_v61 = vsel %vm1570_vm2, %v730_v37, %v726_v9  ;;  %vm754_vm9 = vweird.f32 %v1072_v44 }
 0x1e2   : >> { %v751_v6 = vmul.f32 %v1072_v44, %v750_v14  ;;  %v757_v8 = vand.u32 2147483647, %v1529_v30  ;;  %vm743_vm5 = vcmp.eq.f32.partialorder %v742_v42, 8.507059e+37  ;;  %vm753_vm10 = vweird.f32 %v1529_v30 }
 0x1e3   : >> { %v741_v25 = vsel %vm740_vm0, %v1070_v13, %v737_v27  ;;  %v732_v34 = vmul.f32 %v1490_v10, %v731_v61  ;;  %v1769_v22 = vrot.slane %v1143_v0, 1  ;;  %vm755_vm2 = vmor %vm753_vm10, %vm754_vm9  ;;  %v760_v4 = vor.u32 1.1754944e-38, %v759_v63 }
 0x1e4   : >> { %v746_v35 = vsel %vm743_vm5, %v745_v39, %v741_v25  ;;  %v752_v15 = vadd.f32 %v1072_v44, %v751_v6  ;;  %v1770_v36 = vrot.slane %v1143_v0, 2  ;;  %v1771_v37 = vrot.slane %v1143_v0, 3 }
 0x1e5   : >> { %v787_v20 = vmul.f32 %v687_v33, %v1769_v22  ;;  %vm758_vm1 = vcmp.eq.f32.partialorder %v757_v8, 8.507059e+37  ;;  %v786_v30 = vmul.f32 %v672_v26, %v1143_v0  ;;  %v747_v10 = vmul.f32 %v1495_v28, %v746_v35 }
 0x1e6   : >> { %v788_v31 = vmul.f32 %v702_v38, %v1770_v36  ;;  %v789_v32 = vmul.f32 %v717_v12, %v1771_v37  ;;  %v1074_v3 = vpop.eup %1073  ;;  %v756_v13 = vsel %vm755_vm2, %v1072_v44, %v752_v15  ;;  %v1772_v17 = vrot.slane %v1143_v0, 4  ;;  %v842_v36 = vld [vmem:[%s1686_s5 + $0x38] sm:$0xff] (%p318_p4)  ;;  %v840_v37 = vld [vmem:[%s1686_s5 + $0x28] sm:$0xff] (%p318_p4) }
 0x1e7   : >> { %v802_v46 = vrot.slane %v787_v20, 7  ;;  %v761_v29 = vsel %vm758_vm1, %v760_v4, %v756_v13  ;;  %v764_v41 = vmul.f32 %v1074_v3, %v1531_v23  ;;  %vm1773_vm11 = vcmask 1041409   ;;  %855 = vmatpush.msra.mxu0 (%p318_p4), %v842_v36 }
 0x1e8   : >> { %v790_v40 = vmul.f32 %v732_v34, %v1772_v17  ;;  %v804_v60 = vrot.slane %v788_v31, 6  ;;  %v806_v2 = vrot.slane %v789_v32, 5  ;;  %v762_v62 = vmul.f32 %v1499_v18, %v761_v29  ;;  %v841_v31 = vld [vmem:[%s1686_s5 + $0x30] sm:$0xff] (%p318_p4) }
 0x1e9   : >> { %v803_v42 = vsel %vm1773_vm11, %v802_v46, %v786_v30  ;;  %v765_v43 = vsub.f32 1.0, %v764_v41  ;;  %v772_v44 = vand.u32 2147483647, %v1531_v23  ;;  %v774_v11 = vand.u32 2147483648, %v1531_v23  ;;  %856 = vmatpush.msra.mxu0 (%p318_p4), %v841_v31 }
 0x1ea   : >> { %vm1774_vm12 = vcmask 1042434   ;;  %vm769_vm13 = vweird.f32 %v1074_v3  ;;  %v1775_v21 = vrot.slane %v1143_v0, 5  ;;  %vm1776_vm14 = vcmask 1043459  }
 0x1eb   : >> { %v805_v1 = vsel %vm1774_vm12, %v804_v60, %v803_v42  ;;  %v766_v28 = vmul.f32 %v1074_v3, %v765_v43  ;;  %v808_v45 = vrot.slane %v790_v40, 4  ;;  %vm768_vm8 = vweird.f32 %v1531_v23  ;;  %857 = vmatpush.msra.mxu0 (%p318_p4), %v840_v37 }
 0x1ec   : >> { %v791_v24 = vmul.f32 %v747_v10, %v1775_v21  ;;  %v807_v39 = vsel %vm1776_vm14, %v806_v2, %v805_v1  ;;  %vm770_vm15 = vmor %vm768_vm8, %vm769_vm13  ;;  %v775_v7 = vor.u32 1.1754944e-38, %v774_v11  ;;  %v1777_v18 = vrot.slane %v1143_v0, 6 }
 0x1ed   : >> { %v767_v26 = vadd.f32 %v1074_v3, %v766_v28  ;;  %vm1778_vm4 = vcmask 1044484   ;;  %vm773_vm6 = vcmp.eq.f32.partialorder %v772_v44, 8.507059e+37  ;;  %vm1779_vm7 = vcmask 1045509  }
 0x1ee   : >> { %v792_v16 = vmul.f32 %v762_v62, %v1777_v18  ;;  %v809_v19 = vsel %vm1778_vm4, %v808_v45, %v807_v39  ;;  %v810_v38 = vrot.slane %v791_v24, 3  ;;  %v1780_v63 = vrot.slane %v1143_v0, 7  ;;  %v839_v0 = vld [vmem:[%s1686_s5 + $0x20] sm:$0xff] (%p318_p4) }
 0x1ef   : >> { %v771_v33 = vsel %vm770_vm15, %v1074_v3, %v767_v26  ;;  %vm1781_vm3 = vcmask 1046534   ;;  %vm1782_vm0 = vcmask 1047559   ;;  %vm1783_vm9 = vcmask 261120   ;;  %858 = vmatpush.msra.mxu0 (%p318_p4), %v839_v0 }
 0x1f0   : >> { %v776_v14 = vsel %vm773_vm6, %v775_v7, %v771_v33  ;;  %v811_v9 = vsel %vm1779_vm7, %v810_v38, %v809_v19  ;;  %v812_v27 = vrot.slane %v792_v16, 2  ;;  %vm825_vm5 = vcmask 253952  }
 0x1f1   : >> { %v777_v12 = vmul.f32 %v1503_v5, %v776_v14  ;;  %859 = vmatpush.msra.mxu0 (%p318_p4), %v838_v47  ;;  %vm843_vm10 = vcmask (%p318_p4), 523264   ;;  %vm1784_vm2 = vcmask (%p318_p4), 261120  }
 0x1f2   : >> { %v813_v61 = vsel %vm1781_vm3, %v812_v27, %v811_v9 }
 0x1f3   : >> { %v793_v23 = vmul.f32 %v777_v12, %v1780_v63  ;;  %860 = vmatpush.msra.mxu0 (%p318_p4), %v837_v48 }
 0x1f5   : >> { %v814_v6 = vrot.slane %v793_v23, 1  ;;  %861 = vmatpush.msra.mxu0 (%p318_p4), %v836_v49 }
 0x1f7   : >> { %v815_v8 = vsel %vm1782_vm0, %v814_v6, %v813_v61  ;;  %862 = vmatpush.msra.mxu0 (%p318_p4), %v835_v50 }
 0x1f8   : >> { %v817_v25 = vsel %vm1783_vm9, %v815_v8, 0.0 }
 0x1f9   : >> { %v818_v34 = vrot.slane %v817_v25, 4 }
 0x1fb   : >> { %v819_v35 = vadd.f32 %v818_v34, %v817_v25 }
 0x1fd   : >> { %v820_v15 = vrot.slane %v819_v35, 2 }
 0x1ff   : >> { %v821_v22 = vadd.f32 %v820_v15, %v819_v35 }
 0x201   : >> { %v822_v20 = vrot.slane %v821_v22, 1  ;;  %320 = sbr.rel (!%p318_p4) target bundleno = 40 (0x28), region = 83 }
 0x203   : >> { %v823_v5 = vadd.f32 %v822_v20, %v821_v22 }
 0x205   : >> { %826 = vst.msk [vmem:[%s824_s11] sm:$0x1] %vm825_vm5, %v823_v5 }
 0x20c   : > { %v828_v4 = vld [vmem:[#allocation2] sm:$0xff] }
 0x20d   : > { %830 = vrot.lane.b32.xlu0 %v828_v4, %s1096_s16 }
 0x27f   : > { %v831_v52 = vpop.permute.xlu0 %830 }
 0x280   : > { %v834_v53 = vsel %vm1784_vm2, %v827_v51, %v831_v52 }
 0x281   : > { %955 = vmatmul.msk.f32.vlgmr.msra.gmra.mxu0 %vm843_vm10, %v834_v53 }
 0x2fe   : > { %v864_v54 = vpop.f32.mrf.mxu0 }
 0x2ff   : > { %v867_v55 = vsub.f32 0.0, %v864_v54 }
 0x301   : > { %v868_v56 = vmul.f32 1.442695, %v867_v55 }
 0x303   : > { %1075 = vpow2.f32 %v868_v56 }
 0x309   : > { %v1076_v57 = vpop.eup %1075 }
 0x30a   : > { %v870_v58 = vadd.f32 1.0, %v1076_v57 }
 0x30c   : > { %1077 = vrcp.f32 %v870_v58  ;;  %v882_v13 = vand.u32 2147483648, %v870_v58  ;;  %v880_v46 = vand.u32 2147483647, %v870_v58  ;;  %vm876_vm11 = vweird.f32 %v870_v58 }
 0x30e   : > { %v883_v29 = vor.u32 1.1754944e-38, %v882_v13  ;;  %vm881_vm13 = vcmp.eq.f32.partialorder %v880_v46, 8.507059e+37 }
 0x312   : > { %v1078_v59 = vpop.eup %1077 }
 0x313   : > { %v872_v32 = vmul.f32 %v1078_v59, %v870_v58  ;;  %vm877_vm1 = vweird.f32 %v1078_v59 }
 0x314   : > { %vm878_vm12 = vmor %vm876_vm11, %vm877_vm1 }
 0x315   : > { %v873_v3 = vsub.f32 1.0, %v872_v32 }
 0x317   : > { %v874_v30 = vmul.f32 %v1078_v59, %v873_v3 }
 0x319   : > { %v875_v10 = vadd.f32 %v1078_v59, %v874_v30 }
 0x31b   : > { %v879_v41 = vsel %vm878_vm12, %v1078_v59, %v875_v10 }
 0x31c   : > { %v884_v17 = vsel %vm881_vm13, %v883_v29, %v879_v41 }
 0x31d   : > { %v886_v40 = vmul.f32 %v884_v17, %v834_v53 }
 0x31f   : > { %887 = vst.msk [vmem:[%s1221_s8] sm:$0xff] %vm843_vm10, %v886_v40 }
 0x320 PF: > { %s16_s21 = sadd.s32 1, %s1089_s21  }
 0x321   : > { %p13_p5 = scmp.ge.s32.totalorder %s16_s21, 5  }
 0x323   :  { %15 = sbr.rel (!%p13_p5) target bundleno = 1 (0x1), region = 94 }

// kernel: evidence_extractor_forward.10
= control target key start
LH: loop header
LB: loop body
LE: loop exit
PB: predicated region body
PF: predicated region fallthrough
CT: control target
= control target key end

     0   :  { %vm54_vm0 = vcmask 261120   ;;  %vm105_vm1 = vcmask 195584   ;;  %vm164_vm2 = vcmask 188416   ;;  %vm285_vm3 = vcmask 7168   ;;  %s815_s0 = inlined_call_operand.vmem [shape: f32[24,32], index: 0, kind: input, shape index: {}]   ;;  %s816_s1 = inlined_call_operand.vmem [shape: f32[1,32], index: 1, kind: input, shape index: {}]   ;;  %s817_s3 = inlined_call_operand.vmem [shape: f32[32,32], index: 3, kind: input, shape index: {}]   ;;  %s818_s6 = inlined_call_operand.vmem [shape: f32[32,32], index: 6, kind: input, shape index: {}]   ;;  %s819_s7 = inlined_call_operand.vmem [shape: f32[32,32], index: 7, kind: input, shape index: {}]   ;;  %s820_s2 = inlined_call_operand.vmem [shape: f32[32,32], index: 2, kind: input, shape index: {}]   ;;  %s821_s11 = inlined_call_operand.vmem [shape: f32[32,24], index: 11, kind: output, shape index: {0}]   ;;  %s822_s5 = inlined_call_operand.vmem [shape: f32[1,32], index: 5, kind: input, shape index: {}]   ;;  %s823_s4 = inlined_call_operand.vmem [shape: f32[32,1], index: 4, kind: input, shape index: {}]   ;;  %s824_s12 = inlined_call_operand.vmem [shape: f32[1,24], index: 12, kind: output, shape index: {1}]   ;;  %s825_s8 = inlined_call_operand.vmem [shape: f32[32,64], index: 8, kind: input, shape index: {}]   ;;  %s826_s9 = inlined_call_operand.vmem [shape: f32[32,64], index: 9, kind: input, shape index: {}]   ;;  %s827_s10 = inlined_call_operand.vmem [shape: f32[64,1], index: 10, kind: input, shape index: {}]   ;;  %s828_s13 = inlined_call_operand.vmem [shape: f32[3,1], index: 13, kind: output, shape index: {2}]  }
   0x1   :  { %v625_v0 = vld [vmem:[%s815_s0 + $0x10] sm:$0xff]  ;;  %v111_v1 = vld [vmem:[%s817_s3 + $0x8] sm:$0xff]  ;;  %v522_v3 = vld [vmem:[%s816_s1] ss:$0 sm:$0xff] }
   0x2   :  { %501 = vmatpush.xpose.msk.msra.mxu0 %vm54_vm0, %v625_v0  ;;  %v635_v2 = vld [vmem:[%s815_s0 + $0x8] sm:$0xff]  ;;  %v195_v4 = vld [vmem:[%s818_s6 + $0x18] sm:$0xff]  ;;  %v194_v5 = vld [vmem:[%s818_s6 + $0x10] sm:$0xff]  ;;  %v118_v6 = vmul.f32 %v522_v3, %v111_v1 }
   0x3   :  { %209 = vmatpush.msra.mxu3 %v195_v4  ;;  %v193_v7 = vld [vmem:[%s818_s6 + $0x8] sm:$0xff]  ;;  %v113_v8 = vld [vmem:[%s817_s3 + $0x18] sm:$0xff]  ;;  %v110_v9 = vld [vmem:[%s817_s3] sm:$0xff] }
   0x4   :  { %v120_v10 = vmul.f32 %v522_v3, %v113_v8  ;;  %v169_v11 = vld [vmem:[%s819_s7 + $0x18] sm:$0xff]  ;;  %v168_v12 = vld [vmem:[%s819_s7 + $0x10] sm:$0xff]  ;;  %v666_v13 = vld [vmem:[%s815_s0] sm:$0xff]  ;;  %v124_v14 = vsel %vm54_vm0, %v118_v6, 0.0  ;;  %v117_v19 = vmul.f32 %v522_v3, %v110_v9 }
   0x5   :  { %210 = vmatpush.msra.mxu3 %v194_v5  ;;  %v192_v15 = vld [vmem:[%s818_s6] sm:$0xff]  ;;  %184 = vmatpush.msra.mxu2 %v169_v11  ;;  %v112_v16 = vld [vmem:[%s817_s3 + $0x10] sm:$0xff]  ;;  %v167_v18 = vld [vmem:[%s819_s7 + $0x8] sm:$0xff] }
   0x6   :  { %502 = vmatpush.xpose.msk.msra.mxu0 %vm54_vm0, %v635_v2  ;;  %125 = vadd.xlane.f32.xlu1 %v124_v14  ;;  %v130_v17 = vsel %vm54_vm0, %v120_v10, 0.0  ;;  %v50_v20 = vld [vmem:[%s820_s2] sm:$0xff]  ;;  %v119_v21 = vmul.f32 %v522_v3, %v112_v16  ;;  %v121_v24 = vsel %vm54_vm0, %v117_v19, 0.0  ;;  %v51_v26 = vld [vmem:[%s820_s2 + $0x8] sm:$0xff]  ;;  %v52_v27 = vld [vmem:[%s820_s2 + $0x10] sm:$0xff] }
   0x7   :  { %211 = vmatpush.msra.mxu3 %v193_v7  ;;  %131 = vadd.xlane.f32.xlu0 %v130_v17  ;;  %v166_v22 = vld [vmem:[%s819_s7] sm:$0xff]  ;;  %v53_v28 = vld [vmem:[%s820_s2 + $0x18] sm:$0xff]  ;;  %v47_v52 = vld [vmem:[%s823_s4 + $0x10] sm:$0xff] }
   0x8   :  { %185 = vmatpush.msra.mxu2 %v168_v12  ;;  %v690_v23 = vld [vmem:[%s816_s1] sm:$0x1]  ;;  %v127_v25 = vsel %vm54_vm0, %v119_v21, 0.0  ;;  %v48_v50 = vld [vmem:[%s823_s4 + $0x18] sm:$0xff]  ;;  %v46_v53 = vld [vmem:[%s823_s4 + $0x8] sm:$0xff] }
   0x9   :  { %212 = vmatpush.msra.mxu3 %v192_v15  ;;  %v49_v48 = vld [vmem:[%s822_s5] sm:$0x1] }
   0xa   :  { %503 = vmatpush.xpose.msk.msra.mxu0 %vm54_vm0, %v666_v13  ;;  %510 = vmatmul.msk.f32.vlgmr.msra.gmra.mxu3 %vm54_vm0, %v666_v13  ;;  %v45_v54 = vld [vmem:[%s823_s4] sm:$0xff] }
   0xb   :  { %186 = vmatpush.msra.mxu2 %v167_v18 }
   0xd   :  { %504 = vmatmul.msk.f32.vlgmr.msra.gmra.mxu0 %vm54_vm0, %v50_v20  ;;  %187 = vmatpush.msra.mxu2 %v166_v22 }
   0xe   :  { %509 = vmatmul.msk.f32.vlgmr.msra.gmra.mxu2 %vm54_vm0, %v690_v23  ;;  %122 = vadd.xlane.f32.xlu1 %v121_v24 }
   0xf   :  { %128 = vadd.xlane.f32.xlu0 %v127_v25 }
  0x12   :  { %511 = vmatmul.msk.f32.gmra.mxu3 %vm54_vm0, %v635_v2 }
  0x15   :  { %505 = vmatmul.msk.f32.gmra.mxu0 %vm54_vm0, %v51_v26  ;;  %v551_v26 = vmov 0  }
  0x16   :  { %520 = vset.pattern.permute.xlu2 %v551_v26  ;;  %521 = vset.pattern.permute.xlu0 %v551_v26 }
  0x1a   :  { %512 = vmatmul.msk.f32.gmra.mxu3 %vm54_vm0, %v625_v0 }
  0x1d   :  { %506 = vmatmul.msk.f32.gmra.mxu0 %vm54_vm0, %v52_v27 }
  0x25   :  { %507 = vmatmul.msk.f32.gmra.mxu0 %vm54_vm0, %v53_v28 }
  0x79   :  { %v126_v32 = vpop.xlane.xlu1 %125 }
  0x7a   :  { %v132_v31 = vpop.xlane.xlu0 %131 }
  0x81   :  { %v123_v38 = vpop.xlane.xlu1 %122 }
  0x82   :  { %v129_v34 = vpop.xlane.xlu0 %128 }
  0x8a   :  { %v93_v29 = vpop.f32.mrf.mxu0 }
  0x8b   :  { %106 = vst.msk [vmem:[%s821_s11] sm:$0xff] %vm105_vm1, %v93_v29  ;;  %v133_v40 = vadd.f32 %v123_v38, %v93_v29 }
  0x8d   :  { %v214_v42 = vpop.f32.mrf.mxu3 }
  0x91   :  { %v189_v41 = vpop.f32.mrf.mxu2 }
  0x92   :  { %v96_v30 = vpop.f32.mrf.mxu0  ;;  %v196_v43 = vperm.slane %v189_v41, 0 }
  0x93   :  { %107 = vst.msk [vmem:[%s821_s11 + $0x8] sm:$0xff] %vm105_vm1, %v96_v30  ;;  %v134_v39 = vadd.f32 %v126_v32, %v96_v30 }
  0x94   :  { %v215_v46 = vadd.f32 %v214_v42, %v196_v43 }
  0x95   :  { %v217_v51 = vpop.f32.mrf.mxu3 }
  0x96   :  { %v218_v56 = vadd.f32 %v217_v51, %v196_v43 }
  0x9a   :  { %v99_v33 = vpop.f32.mrf.mxu0 }
  0x9b   :  { %108 = vst.msk [vmem:[%s821_s11 + $0x10] sm:$0xff] %vm105_vm1, %v99_v33  ;;  %v135_v36 = vadd.f32 %v129_v34, %v99_v33 }
  0x9d   :  { %v220_v57 = vpop.f32.mrf.mxu3 }
  0x9e   :  { %v221_v58 = vadd.f32 %v220_v57, %v196_v43 }
  0xa2   :  { %v102_v35 = vpop.f32.mrf.mxu0 }
  0xa3   :  { %109 = vst.msk [vmem:[%s821_s11 + $0x18] sm:$0xff] %vm105_vm1, %v102_v35  ;;  %v136_v37 = vadd.f32 %v132_v31, %v102_v35  ;;  %vm421_vm1 = vcmask 1040384  }
  0xa5   :  { %523 = vtanh.f32 %v136_v37 }
  0xa6   :  { %525 = vtanh.f32 %v135_v36 }
  0xa7   :  { %527 = vtanh.f32 %v134_v39 }
  0xa8   :  { %529 = vtanh.f32 %v133_v40 }
  0xa9   :  { %531 = vtanh.f32 %v215_v46 }
  0xaa   :  { %533 = vtanh.f32 %v218_v56 }
  0xab   :  { %v524_v44 = vpop.eup %523  ;;  %535 = vtanh.f32 %v221_v58 }
  0xac   :  { %156 = vmatpush.msra.mxu1 %v524_v44  ;;  %v526_v45 = vpop.eup %525 }
  0xad   :  { %v528_v47 = vpop.eup %527 }
  0xae   :  { %157 = vmatpush.msra.mxu1 %v526_v45  ;;  %v530_v49 = vpop.eup %529 }
  0xaf   :  { %v532_v55 = vpop.eup %531 }
  0xb0   :  { %158 = vmatpush.msra.mxu1 %v528_v47  ;;  %v534_v59 = vpop.eup %533 }
  0xb1   :  { %v536_v60 = vpop.eup %535 }
  0xb2   :  { %159 = vmatpush.msra.mxu1 %v530_v49 }
  0xb3   :  { %508 = vmatmul.msk.f32.vlgmr.msra.gmra.mxu1 %vm54_vm0, %v49_v48 }
  0xb4   :  { %247 = vmatpush.msrb.mxu1 %v48_v50 }
  0xb6   :  { %248 = vmatpush.msrb.mxu1 %v47_v52 }
  0xb8   :  { %249 = vmatpush.msrb.mxu1 %v46_v53 }
  0xba   :  { %250 = vmatpush.msrb.mxu1 %v45_v54 }
  0xbb   :  { %513 = vmatmul.msk.f32.vlgmr.msrb.gmra.mxu1 %vm54_vm0, %v532_v55 }
  0xc3   :  { %514 = vmatmul.msk.f32.gmra.mxu1 %vm54_vm0, %v534_v59 }
  0xcb   :  { %515 = vmatmul.msk.f32.gmra.mxu1 %vm54_vm0, %v536_v60 }
 0x130   :  { %v161_v61 = vpop.f32.mrf.mxu1 }
 0x131   :  { %165 = vst.msk [vmem:[%s824_s12] sm:$0x1] %vm164_vm2, %v161_v61  ;;  %vm423_vm2 = vcmask 1041408  }
 0x138   :  { %v252_v62 = vpop.f32.mrf.mxu1 }
 0x139   :  { %v286_v63 = vsel %vm285_vm3, %v252_v62, -inf }
 0x13a   :  { %v287_v1 = vrot.slane %v286_v63, 4 }
 0x13c   :  { %v288_v3 = vmax.f32 %v286_v63, %v287_v1 }
 0x13e   :  { %v289_v4 = vrot.slane %v288_v3, 2 }
 0x140   :  { %v290_v5 = vmax.f32 %v288_v3, %v289_v4  ;;  %v255_v6 = vpop.f32.mrf.mxu1 }
 0x141   :  { %v331_v7 = vsel %vm285_vm3, %v255_v6, -inf }
 0x142   :  { %v291_v8 = vrot.slane %v290_v5, 1  ;;  %v332_v9 = vrot.slane %v331_v7, 4 }
 0x144   :  { %v292_v10 = vmax.f32 %v290_v5, %v291_v8  ;;  %v333_v11 = vmax.f32 %v331_v7, %v332_v9 }
 0x146   :  { %v293_v12 = vsub.f32 %v252_v62, %v292_v10  ;;  %v334_v14 = vrot.slane %v333_v11, 2 }
 0x148   :  { %v294_v15 = vmul.f32 1.442695, %v293_v12  ;;  %v335_v16 = vmax.f32 %v333_v11, %v334_v14  ;;  %v258_v17 = vpop.f32.mrf.mxu1 }
 0x149   :  { %v376_v18 = vsel %vm285_vm3, %v258_v17, -inf }
 0x14a   :  { %537 = vpow2.f32 %v294_v15  ;;  %v336_v19 = vrot.slane %v335_v16, 1  ;;  %v377_v20 = vrot.slane %v376_v18, 4 }
 0x14c   :  { %v337_v21 = vmax.f32 %v335_v16, %v336_v19  ;;  %v378_v22 = vmax.f32 %v376_v18, %v377_v20 }
 0x14e   :  { %v338_v24 = vsub.f32 %v255_v6, %v337_v21  ;;  %v379_v25 = vrot.slane %v378_v22, 2 }
 0x150   :  { %v538_v27 = vpop.eup %537  ;;  %v339_v28 = vmul.f32 1.442695, %v338_v24  ;;  %v380_v29 = vmax.f32 %v378_v22, %v379_v25 }
 0x151   :  { %v296_v30 = vsel %vm285_vm3, %v538_v27, 0.0 }
 0x152   :  { %v297_v31 = vrot.slane %v296_v30, 4  ;;  %539 = vpow2.f32 %v339_v28  ;;  %v381_v32 = vrot.slane %v380_v29, 1 }
 0x154   :  { %v298_v33 = vadd.f32 %v297_v31, %v296_v30  ;;  %v382_v34 = vmax.f32 %v380_v29, %v381_v32  ;;  %v264_v30 = vld [vmem:[%s825_s8 + $0x18] sm:$0xff]  ;;  %v263_v32 = vld [vmem:[%s825_s8 + $0x10] sm:$0xff] }
 0x155   :  { %277 = vmatpush.msrb.mxu2 %v264_v30 }
 0x156   :  { %v299_v35 = vrot.slane %v298_v33, 2  ;;  %v383_v36 = vsub.f32 %v258_v17, %v382_v34  ;;  %v261_v34 = vld [vmem:[%s825_s8] sm:$0xff] }
 0x157   :  { %278 = vmatpush.msrb.mxu2 %v263_v32 }
 0x158   :  { %v540_v37 = vpop.eup %539  ;;  %v300_v38 = vadd.f32 %v299_v35, %v298_v33  ;;  %v384_v39 = vmul.f32 1.442695, %v383_v36  ;;  %v262_v33 = vld [vmem:[%s825_s8 + $0x8] sm:$0xff]  ;;  %v428_v35 = vld [vmem:[%s826_s9 + $0x18] sm:$0xff]  ;;  %v427_v36 = vld [vmem:[%s826_s9 + $0x10] sm:$0xff] }
 0x159   :  { %v341_v40 = vsel %vm285_vm3, %v540_v37, 0.0  ;;  %279 = vmatpush.msrb.mxu2 %v262_v33 }
 0x15a   :  { %v301_v41 = vrot.slane %v300_v38, 1  ;;  %v342_v42 = vrot.slane %v341_v40, 4  ;;  %541 = vpow2.f32 %v384_v39  ;;  %v425_v39 = vld [vmem:[%s826_s9] sm:$0xff] }
 0x15b   :  { %280 = vmatpush.msrb.mxu2 %v261_v34 }
 0x15c   :  { %v302_v43 = vadd.f32 %v301_v41, %v300_v38  ;;  %v343_v44 = vadd.f32 %v342_v42, %v341_v40  ;;  %516 = vmatmul.msk.f32.vlgmr.msrb.gmra.mxu2 %vm54_vm0, %v690_v23  ;;  %v426_v38 = vld [vmem:[%s826_s9 + $0x8] sm:$0xff]  ;;  %v462_v40 = vld [vmem:[%s827_s10 + $0x38] sm:$0xff]  ;;  %v461_v41 = vld [vmem:[%s827_s10 + $0x30] sm:$0xff] }
 0x15d   :  { %444 = vmatpush.msra.mxu2 %v428_v35  ;;  %475 = vmatpush.msrb.mxu3 %v462_v40 }
 0x15e   :  { %543 = vrcp.f32 %v302_v43  ;;  %v344_v45 = vrot.slane %v343_v44, 2  ;;  %v314_v58 = vand.u32 2147483648, %v302_v43  ;;  %v312_v60 = vand.u32 2147483647, %v302_v43 }
 0x15f   :  { %vm308_vm5 = vweird.f32 %v302_v43  ;;  %445 = vmatpush.msra.mxu2 %v427_v36  ;;  %476 = vmatpush.msrb.mxu3 %v461_v41 }
 0x160   :  { %v542_v46 = vpop.eup %541  ;;  %v345_v47 = vadd.f32 %v344_v45, %v343_v44  ;;  %v315_v3 = vor.u32 1.1754944e-38, %v314_v58  ;;  %vm313_vm7 = vcmp.eq.f32.partialorder %v312_v60, 8.507059e+37 }
 0x161   :  { %v386_v48 = vsel %vm285_vm3, %v542_v46, 0.0  ;;  %446 = vmatpush.msra.mxu2 %v426_v38  ;;  %vm487_vm3 = vcmask 2048  }
 0x162   :  { %v346_v49 = vrot.slane %v345_v47, 1  ;;  %v387_v50 = vrot.slane %v386_v48, 4 }
 0x163   :  { %447 = vmatpush.msra.mxu2 %v425_v39 }
 0x164   :  { %v544_v51 = vpop.eup %543  ;;  %v347_v52 = vadd.f32 %v346_v49, %v345_v47  ;;  %v388_v53 = vadd.f32 %v387_v50, %v386_v48 }
 0x165   :  { %v304_v54 = vmul.f32 %v544_v51, %v302_v43  ;;  %vm309_vm4 = vweird.f32 %v544_v51 }
 0x166   :  { %545 = vrcp.f32 %v347_v52  ;;  %v389_v55 = vrot.slane %v388_v53, 2  ;;  %vm310_vm6 = vmor %vm308_vm5, %vm309_vm4  ;;  %v359_v9 = vand.u32 2147483648, %v347_v52  ;;  %v357_v11 = vand.u32 2147483647, %v347_v52 }
 0x167   :  { %v305_v56 = vsub.f32 1.0, %v304_v54  ;;  %vm353_vm9 = vweird.f32 %v347_v52 }
 0x168   :  { %v390_v57 = vadd.f32 %v389_v55, %v388_v53  ;;  %v360_v15 = vor.u32 1.1754944e-38, %v359_v9  ;;  %vm358_vm11 = vcmp.eq.f32.partialorder %v357_v11, 8.507059e+37 }
 0x169   :  { %v306_v59 = vmul.f32 %v544_v51, %v305_v56 }
 0x16a   :  { %v391_v61 = vrot.slane %v390_v57, 1 }
 0x16b   :  { %v307_v62 = vadd.f32 %v544_v51, %v306_v59 }
 0x16c   :  { %v546_v63 = vpop.eup %545  ;;  %v392_v1 = vadd.f32 %v391_v61, %v390_v57 }
 0x16d   :  { %v311_v4 = vsel %vm310_vm6, %v544_v51, %v307_v62  ;;  %v349_v5 = vmul.f32 %v546_v63, %v347_v52  ;;  %vm354_vm8 = vweird.f32 %v546_v63 }
 0x16e   :  { %547 = vrcp.f32 %v392_v1  ;;  %v316_v6 = vsel %vm313_vm7, %v315_v3, %v311_v4  ;;  %vm355_vm10 = vmor %vm353_vm9, %vm354_vm8  ;;  %v404_v21 = vand.u32 2147483648, %v392_v1  ;;  %v402_v24 = vand.u32 2147483647, %v392_v1  ;;  %v459_v4 = vld [vmem:[%s827_s10 + $0x20] sm:$0xff] }
 0x16f   :  { %v317_v7 = vmul.f32 %v538_v27, %v316_v6  ;;  %v350_v8 = vsub.f32 1.0, %v349_v5  ;;  %vm398_vm13 = vweird.f32 %v392_v1  ;;  %v458_v5 = vld [vmem:[%s827_s10 + $0x18] sm:$0xff]  ;;  %v457_v6 = vld [vmem:[%s827_s10 + $0x10] sm:$0xff] }
 0x170   :  { %v405_v26 = vor.u32 1.1754944e-38, %v404_v21  ;;  %vm403_vm15 = vcmp.eq.f32.partialorder %v402_v24, 8.507059e+37 }
 0x171   :  { %320 = vperm.xlu2 %520, %v317_v7   ;;  %v351_v10 = vmul.f32 %v546_v63, %v350_v8  ;;  %v456_v7 = vld [vmem:[%s827_s10 + $0x8] sm:$0xff]  ;;  %v455_v8 = vld [vmem:[%s827_s10] sm:$0xff] }
 0x173   :  { %v352_v12 = vadd.f32 %v546_v63, %v351_v10 }
 0x174   :  { %v548_v14 = vpop.eup %547 }
 0x175   :  { %v356_v16 = vsel %vm355_vm10, %v546_v63, %v352_v12  ;;  %v394_v17 = vmul.f32 %v548_v14, %v392_v1  ;;  %vm399_vm12 = vweird.f32 %v548_v14 }
 0x176   :  { %v361_v18 = vsel %vm358_vm11, %v360_v15, %v356_v16  ;;  %vm400_vm14 = vmor %vm398_vm13, %vm399_vm12 }
 0x177   :  { %v362_v19 = vmul.f32 %v540_v37, %v361_v18  ;;  %v395_v20 = vsub.f32 1.0, %v394_v17 }
 0x179   :  { %365 = vperm.xlu2 %520, %v362_v19   ;;  %v396_v22 = vmul.f32 %v548_v14, %v395_v20 }
 0x17b   :  { %v397_v25 = vadd.f32 %v548_v14, %v396_v22 }
 0x17d   :  { %v401_v27 = vsel %vm400_vm14, %v548_v14, %v397_v25 }
 0x17e   :  { %v406_v28 = vsel %vm403_vm15, %v405_v26, %v401_v27 }
 0x17f   :  { %v407_v29 = vmul.f32 %v542_v46, %v406_v28 }
 0x181   :  { %410 = vperm.xlu0 %521, %v407_v29  }
 0x1cb   :  { %v321_v31 = vpop.permute.xlu2 %320 }
 0x1cc   :  { %v323_v42 = vmul.f32 %v321_v31, %v666_v13 }
 0x1ce   :  { %v324_v44 = vsel %vm54_vm0, %v323_v42, 0.0 }
 0x1cf   :  { %v325_v46 = vrot.slane %v324_v44, 4 }
 0x1d1   :  { %v326_v47 = vadd.f32 %v325_v46, %v324_v44 }
 0x1d3   :  { %v366_v37 = vpop.permute.xlu2 %365  ;;  %v327_v50 = vrot.slane %v326_v47, 2 }
 0x1d4   :  { %v368_v23 = vmul.f32 %v366_v37, %v635_v2 }
 0x1d5   :  { %v328_v13 = vadd.f32 %v327_v50, %v326_v47 }
 0x1d6   :  { %v369_v43 = vsel %vm54_vm0, %v368_v23, 0.0 }
 0x1d7   :  { %v370_v45 = vrot.slane %v369_v43, 4  ;;  %v329_v58 = vrot.slane %v328_v13, 1 }
 0x1d9   :  { %v371_v2 = vadd.f32 %v370_v45, %v369_v43  ;;  %v330_v62 = vadd.f32 %v329_v58, %v328_v13 }
 0x1db   :  { %v372_v48 = vrot.slane %v371_v2, 2 }
 0x1dd   :  { %v373_v52 = vadd.f32 %v372_v48, %v371_v2 }
 0x1df   :  { %v374_v56 = vrot.slane %v373_v52, 1  ;;  %v282_v9 = vpop.f32.mrf.mxu2 }
 0x1e0   :  { %v452_v10 = vperm.slane %v282_v9, 0 }
 0x1e1   :  { %v375_v60 = vadd.f32 %v374_v56, %v373_v52 }
 0x1e3   :  { %v422_v1 = vsel %vm421_vm1, %v330_v62, %v375_v60 }
 0x1f3   :  { %v411_v49 = vpop.permute.xlu0 %410 }
 0x1f4   :  { %v413_v51 = vmul.f32 %v411_v49, %v625_v0  ;;  %v460_v0 = vld [vmem:[%s827_s10 + $0x28] sm:$0xff] }
 0x1f5   :  { %477 = vmatpush.msrb.mxu3 %v460_v0 }
 0x1f6   :  { %v414_v53 = vsel %vm54_vm0, %v413_v51, 0.0 }
 0x1f7   :  { %v415_v54 = vrot.slane %v414_v53, 4  ;;  %478 = vmatpush.msrb.mxu3 %v459_v4 }
 0x1f9   :  { %v416_v55 = vadd.f32 %v415_v54, %v414_v53  ;;  %479 = vmatpush.msrb.mxu3 %v458_v5 }
 0x1fb   :  { %v417_v57 = vrot.slane %v416_v55, 2  ;;  %480 = vmatpush.msrb.mxu3 %v457_v6 }
 0x1fd   :  { %v418_v59 = vadd.f32 %v417_v57, %v416_v55  ;;  %481 = vmatpush.msrb.mxu3 %v456_v7 }
 0x1ff   :  { %v419_v61 = vrot.slane %v418_v59, 1  ;;  %482 = vmatpush.msrb.mxu3 %v455_v8 }
 0x201   :  { %v420_v63 = vadd.f32 %v419_v61, %v418_v59 }
 0x203   :  { %v424_v3 = vsel %vm423_vm2, %v422_v1, %v420_v63 }
 0x204   :  { %517 = vmatmul.msk.f32.vlgmr.msra.gmra.mxu2 %vm54_vm0, %v424_v3  ;;  %vm463_vm0 = vcmask 523264  }
 0x287   :  { %v449_v11 = vpop.f32.mrf.mxu2 }
 0x288   :  { %v453_v12 = vadd.f32 %v452_v10, %v449_v11 }
 0x28a   :  { %549 = vtanh.f32 %v453_v12 }
 0x290   :  { %v550_v14 = vpop.eup %549 }
 0x291   :  { %518 = vmatmul.msk.f32.vlgmr.msrb.gmra.mxu3 %vm463_vm0, %v550_v14 }
 0x314   :  { %v484_v15 = vpop.f32.mrf.mxu3 }
 0x315   :  { %488 = vst.msk [vmem:[%s828_s13] sm:$0x7] %vm487_vm3, %v484_v15 }

// kernel: evidence_extractor_forward.11
= control target key start
LH: loop header
LB: loop body
LE: loop exit
PB: predicated region body
PF: predicated region fallthrough
CT: control target
= control target key end

     0   :  { %vm25_vm0 = vcmask 261120   ;;  %vm61_vm1 = vcmask 785408   ;;  %s134_s1 = inlined_call_operand.vmem [shape: f32[32,96], index: 1, kind: input, shape index: {}]   ;;  %s135_s2 = inlined_call_operand.vmem [shape: f32[1,96], index: 2, kind: input, shape index: {}]   ;;  %s136_s0 = inlined_call_operand.vmem [shape: f32[24,32], index: 0, kind: input, shape index: {}]   ;;  %s137_s3 = inlined_call_operand.vmem [shape: f32[24,96], index: 3, kind: output, shape index: {}]  }
   0x1   :  { %v20_v0 = vld [vmem:[%s134_s1 + $0x18] sm:$0xff]  ;;  %v19_v1 = vld [vmem:[%s134_s1 + $0x10] sm:$0xff]  ;;  %v18_v2 = vld [vmem:[%s134_s1 + $0x8] sm:$0xff] }
   0x2   :  { %73 = vmatpush.msra.mxu2 %v20_v0  ;;  %47 = vmatpush.msra.mxu0 %v20_v0  ;;  %v17_v3 = vld [vmem:[%s134_s1] sm:$0xff]  ;;  %v16_v4 = vld [vmem:[%s136_s0 + $0x10] sm:$0xff]  ;;  %v15_v6 = vld [vmem:[%s136_s0 + $0x8] sm:$0xff] }
   0x3   :  { %72 = vmatpush.msra.mxu1 %v20_v0  ;;  %v14_v5 = vld [vmem:[%s136_s0] sm:$0xff] }
   0x4   :  { %75 = vmatpush.msra.mxu2 %v19_v1  ;;  %48 = vmatpush.msra.mxu0 %v19_v1  ;;  %v80_v7 = vld [vmem:[%s135_s2] ss:$0 sm:$0xff] }
   0x5   :  { %74 = vmatpush.msra.mxu1 %v19_v1 }
   0x6   :  { %77 = vmatpush.msra.mxu2 %v18_v2  ;;  %49 = vmatpush.msra.mxu0 %v18_v2 }
   0x7   :  { %76 = vmatpush.msra.mxu1 %v18_v2 }
   0x8   :  { %79 = vmatpush.msra.mxu2 %v17_v3  ;;  %50 = vmatpush.msra.mxu0 %v17_v3 }
   0x9   :  { %71 = vmatmul.msk.f32.vlgmr.msra.gmra.mxu2 %vm25_vm0, %v16_v4  ;;  %78 = vmatpush.msra.mxu1 %v17_v3 }
   0xa   :  { %69 = vmatmul.msk.f32.vlgmr.msra.gmra.mxu0 %vm25_vm0, %v14_v5  ;;  %70 = vmatmul.msk.f32.vlgmr.msra.gmra.mxu1 %vm25_vm0, %v15_v6 }
  0x87   :  { %v52_v8 = vpop.f32.mrf.mxu0  ;;  %v55_v9 = vpop.f32.mrf.mxu1 }
  0x88   :  { %v53_v10 = vadd.f32 %v80_v7, %v52_v8  ;;  %v56_v11 = vadd.f32 %v80_v7, %v55_v9 }
  0x8a   :  { %62 = vst.msk [vmem:[%s137_s3] sm:$0xff] %vm61_vm1, %v53_v10 }
  0x8b   :  { %63 = vst.msk [vmem:[%s137_s3 + $0x8] sm:$0xff] %vm61_vm1, %v56_v11 }
  0x8c   :  { %v58_v12 = vpop.f32.mrf.mxu2 }
  0x8d   :  { %v59_v13 = vadd.f32 %v80_v7, %v58_v12 }
  0x8f   :  { %64 = vst.msk [vmem:[%s137_s3 + $0x10] sm:$0xff] %vm61_vm1, %v59_v13 }

// kernel: evidence_extractor_forward.13
= control target key start
LH: loop header
LB: loop body
LE: loop exit
PB: predicated region body
PF: predicated region fallthrough
CT: control target
= control target key end

     0   :  { %vm29_vm0 = vcmask 261120   ;;  %vm78_vm1 = vcmask 188416   ;;  %s157_s1 = inlined_call_operand.vmem [shape: f32[1,32], index: 1, kind: input, shape index: {}]   ;;  %s158_s2 = inlined_call_operand.vmem [shape: f32[32,32], index: 2, kind: input, shape index: {}]   ;;  %s159_s0 = inlined_call_operand.vmem [shape: f32[32,24], index: 0, kind: input, shape index: {}]   ;;  %s160_s3 = inlined_call_operand.vmem [shape: f32[1,32], index: 3, kind: input, shape index: {}]   ;;  %s161_s4 = inlined_call_operand.vmem [shape: f32[1,24], index: 4, kind: output, shape index: {}]  }
   0x1   :  { %v20_v0 = vld [vmem:[%s158_s2 + $0x18] sm:$0xff]  ;;  %v85_v1 = vld [vmem:[%s157_s1] ss:$0 sm:$0xff]  ;;  %v18_v2 = vld [vmem:[%s158_s2 + $0x8] sm:$0xff] }
   0x2   :  { %v28_v3 = vmul.f32 %v85_v1, %v20_v0  ;;  %v26_v4 = vmul.f32 %v85_v1, %v18_v2  ;;  %v19_v5 = vld [vmem:[%s158_s2 + $0x10] sm:$0xff]  ;;  %v17_v6 = vld [vmem:[%s158_s2] sm:$0xff]  ;;  %v46_v13 = vld [vmem:[%s159_s0 + $0x18] sm:$0xff] }
   0x3   :  { %v27_v9 = vmul.f32 %v85_v1, %v19_v5  ;;  %v25_v10 = vmul.f32 %v85_v1, %v17_v6  ;;  %v44_v17 = vld [vmem:[%s159_s0 + $0x8] sm:$0xff]  ;;  %v45_v18 = vld [vmem:[%s159_s0 + $0x10] sm:$0xff]  ;;  %v43_v19 = vld [vmem:[%s159_s0] sm:$0xff] }
   0x4   :  { %v39_v7 = vsel %vm29_vm0, %v28_v3, 0.0  ;;  %v33_v8 = vsel %vm29_vm0, %v26_v4, 0.0  ;;  %v42_v29 = vld [vmem:[%s160_s3] sm:$0x1] }
   0x5   :  { %40 = vadd.xlane.f32.xlu0 %v39_v7  ;;  %34 = vadd.xlane.f32.xlu1 %v33_v8  ;;  %v36_v11 = vsel %vm29_vm0, %v27_v9, 0.0  ;;  %v30_v12 = vsel %vm29_vm0, %v25_v10, 0.0 }
   0xd   :  { %37 = vadd.xlane.f32.xlu0 %v36_v11  ;;  %31 = vadd.xlane.f32.xlu1 %v30_v12 }
  0x78   :  { %v41_v14 = vpop.xlane.xlu0 %40  ;;  %v35_v15 = vpop.xlane.xlu1 %34 }
  0x79   :  { %v50_v16 = vadd.f32 %v46_v13, %v41_v14  ;;  %v48_v20 = vadd.f32 %v44_v17, %v35_v15 }
  0x7b   :  { %86 = vtanh.f32 %v50_v16 }
  0x80   :  { %v38_v21 = vpop.xlane.xlu0 %37  ;;  %v32_v22 = vpop.xlane.xlu1 %31 }
  0x81   :  { %v87_v23 = vpop.eup %86  ;;  %v49_v24 = vadd.f32 %v45_v18, %v38_v21  ;;  %v47_v25 = vadd.f32 %v43_v19, %v32_v22 }
  0x82   :  { %70 = vmatpush.msra.mxu0 %v87_v23 }
  0x83   :  { %88 = vtanh.f32 %v49_v24 }
  0x84   :  { %90 = vtanh.f32 %v48_v20 }
  0x85   :  { %92 = vtanh.f32 %v47_v25 }
  0x89   :  { %v89_v26 = vpop.eup %88 }
  0x8a   :  { %v91_v27 = vpop.eup %90  ;;  %71 = vmatpush.msra.mxu0 %v89_v26 }
  0x8b   :  { %v93_v28 = vpop.eup %92 }
  0x8c   :  { %72 = vmatpush.msra.mxu0 %v91_v27 }
  0x8e   :  { %73 = vmatpush.msra.mxu0 %v93_v28 }
  0x8f   :  { %84 = vmatmul.msk.f32.vlgmr.msra.gmra.mxu0 %vm29_vm0, %v42_v29 }
 0x10c   :  { %v75_v30 = vpop.f32.mrf.mxu0 }
 0x10d   :  { %79 = vst.msk [vmem:[%s161_s4] sm:$0x1] %vm78_vm1, %v75_v30 }

// kernel: evidence_extractor_forward.12
= control target key start
LH: loop header
LB: loop body
LE: loop exit
PB: predicated region body
PF: predicated region fallthrough
CT: control target
= control target key end

     0   :  { %s346_s9 = smov 0   ;;  %s392_s0 = inlined_call_operand.vmem [shape: f32[24,1,32], index: 0, kind: input, shape index: {}]   ;;  %s393_s1 = inlined_call_operand.vmem [shape: f32[24,1,32], index: 1, kind: input, shape index: {}]   ;;  %s394_s2 = inlined_call_operand.vmem [shape: f32[24,1,32], index: 2, kind: input, shape index: {}]   ;;  %s395_s4 = inlined_call_operand.vmem [shape: f32[32,32], index: 4, kind: input, shape index: {}]   ;;  %s396_s5 = inlined_call_operand.vmem [shape: f32[32,32], index: 5, kind: input, shape index: {}]   ;;  %s397_s6 = inlined_call_operand.vmem [shape: f32[32,32], index: 6, kind: input, shape index: {}]   ;;  %s398_s8 = inlined_call_operand.vmem [shape: f32[24,1,32], index: 8, kind: output, shape index: {}]   ;;  %s399_s3 = inlined_call_operand.vmem [shape: f32[1,32], index: 3, kind: input, shape index: {}]   ;;  %s400_s7 = inlined_call_operand.vmem [shape: f32[1,32], index: 7, kind: input, shape index: {}]  }
   0x1   :  { %v279_v0 = vld [vmem:[%s395_s4] sm:$0xff]  ;;  %v284_v1 = vld [vmem:[%s395_s4 + $0x8] sm:$0xff]  ;;  %v289_v2 = vld [vmem:[%s395_s4 + $0x10] sm:$0xff] }
   0x2   :  { %v294_v3 = vld [vmem:[%s395_s4 + $0x18] sm:$0xff]  ;;  %v299_v4 = vld [vmem:[%s396_s5] sm:$0xff]  ;;  %v304_v5 = vld [vmem:[%s396_s5 + $0x8] sm:$0xff] }
   0x3   :  { %v309_v6 = vld [vmem:[%s396_s5 + $0x10] sm:$0xff]  ;;  %v314_v7 = vld [vmem:[%s396_s5 + $0x18] sm:$0xff]  ;;  %v319_v8 = vld [vmem:[%s397_s6] sm:$0xff] }
   0x4   :  { %v324_v9 = vld [vmem:[%s397_s6 + $0x8] sm:$0xff]  ;;  %v329_v10 = vld [vmem:[%s397_s6 + $0x10] sm:$0xff]  ;;  %v334_v11 = vld [vmem:[%s397_s6 + $0x18] sm:$0xff] }
   0x5   :  { %v339_v12 = vld [vmem:[%s400_s7] sm:$0x1] }
   0x6   :  { %v42_v13 = vld [vmem:[%s399_s3] sm:$0x1]  }
   0x7 LB: > { %66 = vmatpush.msra.mxu0 %v294_v3  ;;  %86 = vmatpush.msra.mxu1 %v314_v7  ;;  %vm50_vm0 = vcmask 261120   ;;  %s114_s7 = scalar_lea.vmem %s392_s0, %s229_s9  ;;  %s136_s12 = scalar_lea.vmem %s393_s1, %s229_s9  ;;  %vm168_vm9 = vcmask 253952   ;;  %s229_s9 = sphi %s346_s9, %s48_s9   ;;  %v225_v13 = vphi %v42_v13, %v166_v13  }
   0x8   : > { %106 = vmatpush.msra.mxu2 %v334_v11  ;;  %v115_v14 = vld [vmem:[%s114_s7] sm:$0x1]  ;;  %s158_s15 = scalar_lea.vmem %s394_s2, %s229_s9  ;;  %s167_s18 = scalar_lea.vmem %s398_s8, %s229_s9 }
   0x9   : > { %67 = vmatpush.msra.mxu0 %v289_v2  ;;  %87 = vmatpush.msra.mxu1 %v309_v6  ;;  %v137_v15 = vld [vmem:[%s136_s12] sm:$0x1]  ;;  %s48_s9 = sadd.s32 1, %s229_s9  }
   0xa   : > { %107 = vmatpush.msra.mxu2 %v329_v10  ;;  %v159_v45 = vld [vmem:[%s158_s15] sm:$0x1]  ;;  %p45_p0 = scmp.ge.s32.totalorder %s48_s9, 24  }
   0xb   : > { %68 = vmatpush.msra.mxu0 %v284_v1  ;;  %88 = vmatpush.msra.mxu1 %v304_v5 }
   0xc   : > { %108 = vmatpush.msra.mxu2 %v324_v9 }
   0xd   : > { %69 = vmatpush.msra.mxu0 %v279_v0  ;;  %89 = vmatpush.msra.mxu1 %v299_v4 }
   0xe   : > { %186 = vmatmul.msk.f32.vlgmr.msra.gmra.mxu0 %vm50_vm0, %v225_v13  ;;  %187 = vmatmul.msk.f32.vlgmr.msra.gmra.mxu1 %vm50_vm0, %v225_v13 }
   0xf   : > { %109 = vmatpush.msra.mxu2 %v319_v8 }
  0x10   : > { %188 = vmatmul.msk.f32.vlgmr.msra.gmra.mxu2 %vm50_vm0, %v225_v13 }
  0x8b   : > { %v71_v16 = vpop.f32.mrf.mxu0  ;;  %v91_v17 = vpop.f32.mrf.mxu1 }
  0x8c   : > { %v116_v18 = vadd.f32 %v115_v14, %v71_v16  ;;  %v138_v19 = vadd.f32 %v137_v15, %v91_v17 }
  0x8e   : > { %v117_v20 = vsub.f32 0.0, %v116_v18  ;;  %v139_v21 = vsub.f32 0.0, %v138_v19 }
  0x90   : > { %v118_v22 = vmul.f32 1.442695, %v117_v20  ;;  %v140_v23 = vmul.f32 1.442695, %v139_v21 }
  0x92   : > { %205 = vpow2.f32 %v118_v22 }
  0x93   : > { %207 = vpow2.f32 %v140_v23  ;;  %v111_v34 = vpop.f32.mrf.mxu2 }
  0x94   : > { %v112_v39 = vadd.f32 %v111_v34, %v339_v12 }
  0x98   : > { %v206_v24 = vpop.eup %205 }
  0x99   : > { %v208_v25 = vpop.eup %207  ;;  %v120_v26 = vadd.f32 1.0, %v206_v24 }
  0x9a   : > { %v142_v27 = vadd.f32 1.0, %v208_v25 }
  0x9b   : > { %209 = vrcp.f32 %v120_v26  ;;  %v132_v35 = vand.u32 2147483648, %v120_v26  ;;  %v130_v37 = vand.u32 2147483647, %v120_v26  ;;  %vm126_vm2 = vweird.f32 %v120_v26 }
  0x9c   : > { %211 = vrcp.f32 %v142_v27  ;;  %vm148_vm5 = vweird.f32 %v142_v27  ;;  %v154_v46 = vand.u32 2147483648, %v142_v27  ;;  %v152_v48 = vand.u32 2147483647, %v142_v27 }
  0x9d   : > { %v133_v41 = vor.u32 1.1754944e-38, %v132_v35  ;;  %vm131_vm4 = vcmp.eq.f32.partialorder %v130_v37, 8.507059e+37 }
  0x9e   : > { %v155_v51 = vor.u32 1.1754944e-38, %v154_v46  ;;  %vm153_vm8 = vcmp.eq.f32.partialorder %v152_v48, 8.507059e+37 }
  0xa1   : > { %v210_v28 = vpop.eup %209 }
  0xa2   : > { %v212_v29 = vpop.eup %211  ;;  %v122_v30 = vmul.f32 %v210_v28, %v120_v26  ;;  %vm127_vm1 = vweird.f32 %v210_v28 }
  0xa3   : > { %v144_v31 = vmul.f32 %v212_v29, %v142_v27  ;;  %vm128_vm3 = vmor %vm126_vm2, %vm127_vm1  ;;  %vm149_vm6 = vweird.f32 %v212_v29 }
  0xa4   : > { %v123_v32 = vsub.f32 1.0, %v122_v30  ;;  %vm150_vm7 = vmor %vm148_vm5, %vm149_vm6 }
  0xa5   : > { %v145_v33 = vsub.f32 1.0, %v144_v31 }
  0xa6   : > { %v124_v36 = vmul.f32 %v210_v28, %v123_v32 }
  0xa7   : > { %v146_v38 = vmul.f32 %v212_v29, %v145_v33 }
  0xa8   : > { %v125_v40 = vadd.f32 %v210_v28, %v124_v36 }
  0xa9   : > { %v147_v43 = vadd.f32 %v212_v29, %v146_v38 }
  0xaa   : > { %v129_v42 = vsel %vm128_vm3, %v210_v28, %v125_v40 }
  0xab   : > { %v134_v44 = vsel %vm131_vm4, %v133_v41, %v129_v42  ;;  %v151_v50 = vsel %vm150_vm7, %v212_v29, %v147_v43 }
  0xac   : > { %v160_v47 = vmul.f32 %v134_v44, %v112_v39  ;;  %v156_v52 = vsel %vm153_vm8, %v155_v51, %v151_v50 }
  0xad   : > { %v163_v53 = vsub.f32 1.0, %v156_v52  ;;  %v165_v56 = vmul.f32 %v225_v13, %v156_v52 }
  0xae   : > { %v161_v49 = vadd.f32 %v160_v47, %v159_v45 }
  0xb0   : > { %213 = vtanh.f32 %v161_v49 }
  0xb6   : > { %v214_v54 = vpop.eup %213 }
  0xb7   : > { %v164_v55 = vmul.f32 %v214_v54, %v163_v53  ;;  %47 = sbr.rel (!%p45_p0) target bundleno = 7 (0x7), region = 63 }
  0xb9   : > { %v166_v13 = vadd.f32 %v165_v56, %v164_v55  }
  0xbb   : > { %169 = vst.msk [vmem:[%s167_s18] sm:$0x1] %vm168_vm9, %v166_v13 }

</bundles_post_ra>
